<compile_context>
chip_gen: v6e
topology: v6e:2x2x1
jax: 0.10.0
libtpu: 0.0.40
codegen_flags: <defaults>
</compile_context>

<pallas_src>
import functools

import jax
import jax.numpy as jnp
from jax import lax
from jax.experimental import pallas as pl
from jax.experimental.pallas import tpu as pltpu

LANE = 128   # lane width; Cout is padded to a multiple of this
LPAD = 8     # left halo width of padded slabs (keeps interior writes sublane-aligned)


def _round_up(x, m):
    return (x + m - 1) // m * m


# -----------------------------------------------------------------------------
# Fused BasicBlock kernel (one grid step == one image)
# -----------------------------------------------------------------------------
def _basic_block_kernel(x_ref, w1_ref, s1_ref, b1_ref, w2_ref, s2_ref, b2_ref,
                        wsc_ref, ssc_ref, bsc_ref, o_ref, xp_ref, yp_ref,
                        *, H, W, Hout, Wout, stride, cin, cpad):
    """Refs:
      x_ref   : (1, H, W, Cin)            NHWC input tile
      w1_ref  : (9, Cin, Cpad)            conv1, one (Cin, Cpad) matrix per tap
      s1_ref  : (1, Cpad)  b1_ref: (1, Cpad)   folded bn1 (f32)
      w2_ref  : (9, Cpad, Cpad)           conv2 per-tap matrices
      s2_ref  : (1, Cpad)  b2_ref: (1, Cpad)   folded bn2 (f32)
      wsc_ref : (Cin, Cpad)               1x1 shortcut (eye for identity)
      ssc_ref : (1, Cpad)  bsc_ref: (1, Cpad)  folded shortcut bn (f32)
      o_ref   : (1, Hout, Wout, Cpad)
    scratch:
      xp_ref  : (H+2,    W+2*LPAD,    Cin)   zero-haloed conv1 input slab
      yp_ref  : (Hout+2, Wout+2*LPAD, Cpad)  zero-haloed conv1 output slab
    """
    f32 = jnp.float32
    HWo = Hout * Wout
    adt = xp_ref.dtype  # activation / compute dtype (f32 or bf16)

    # ---- conv1 input slab: aligned interior write + halo-strip-only zeroing.
    xp_ref[1:H + 1, LPAD:LPAD + W, :] = x_ref[0]
    xp_ref[0:1, :, :] = jnp.zeros((1,) + xp_ref.shape[1:], adt)
    xp_ref[H + 1:H + 2, :, :] = jnp.zeros((1,) + xp_ref.shape[1:], adt)
    xp_ref[1:H + 1, LPAD - 1:LPAD, :] = jnp.zeros((H, 1, cin), adt)
    xp_ref[1:H + 1, LPAD + W:LPAD + W + 1, :] = jnp.zeros((H, 1, cin), adt)

    # ---- conv1 + bn1 + relu: 9 accumulating dots (K = Cin), stride at load.
    acc1 = None
    center = None  # tap (ky=1, kx=1) == x[::stride, ::stride]; reused by shortcut
    for ky in range(3):
        for kx in range(3):
            if stride == 1:
                patch = xp_ref[ky:ky + Hout, LPAD - 1 + kx:LPAD - 1 + kx + Wout, :]
            else:
                patch = xp_ref[pl.ds(ky, Hout, stride),
                               pl.ds(LPAD - 1 + kx, Wout, stride), :]
            patch = patch.reshape(HWo, cin)
            d = jnp.dot(patch, w1_ref[3 * ky + kx], preferred_element_type=f32)
            acc1 = d if acc1 is None else acc1 + d
            if ky == 1 and kx == 1:
                center = patch
    y1 = jnp.maximum(acc1 * s1_ref[...] + b1_ref[...], 0.0)

    # ---- conv1 output slab (never leaves the chip) + halo strips. ----------
    yp_ref[1:Hout + 1, LPAD:LPAD + Wout, :] = (
        y1.reshape(Hout, Wout, cpad).astype(adt))
    yp_ref[0:1, :, :] = jnp.zeros((1,) + yp_ref.shape[1:], adt)
    yp_ref[Hout + 1:Hout + 2, :, :] = jnp.zeros((1,) + yp_ref.shape[1:], adt)
    yp_ref[1:Hout + 1, LPAD - 1:LPAD, :] = jnp.zeros((Hout, 1, cpad), adt)
    yp_ref[1:Hout + 1, LPAD + Wout:LPAD + Wout + 1, :] = jnp.zeros(
        (Hout, 1, cpad), adt)

    # ---- conv2 + bn2: 9 accumulating dots (K = Cpad), stride 1. -------------
    acc2 = None
    for ky in range(3):
        for kx in range(3):
            patch = yp_ref[ky:ky + Hout, LPAD - 1 + kx:LPAD - 1 + kx + Wout, :]
            patch = patch.reshape(HWo, cpad)
            d = jnp.dot(patch, w2_ref[3 * ky + kx], preferred_element_type=f32)
            acc2 = d if acc2 is None else acc2 + d
    y2 = acc2 * s2_ref[...] + b2_ref[...]

    # ---- shortcut (projection, or eye-projection for identity). ------------
    sc = jnp.dot(center, wsc_ref[...], preferred_element_type=f32)
    sc = sc * ssc_ref[...] + bsc_ref[...]

    # ---- residual add + final relu + lane-dense store. ---------------------
    out = jnp.maximum(y2 + sc, 0.0)
    o_ref[...] = out.reshape(1, Hout, Wout, cpad).astype(o_ref.dtype)


# -----------------------------------------------------------------------------
# Wrappers
# -----------------------------------------------------------------------------
def basic_block_forward_nhwc(x, params, stride, out_channels):
    """NHWC-in / NHWC-out (no relayout passes). x: (N, H, W, Cin)."""
    N, H, W, Cin = x.shape
    assert H % stride == 0 and W % stride == 0
    Hout, Wout = H // stride, W // stride
    cpad = params["s1"].shape[-1]
    cdt = x.dtype                       # compute dtype follows the activations

    w1 = params["w1"].astype(cdt)
    w2 = params["w2"].astype(cdt)
    wsc = params["w_sc"].astype(cdt)

    kernel = functools.partial(
        _basic_block_kernel, H=H, W=W, Hout=Hout, Wout=Wout,
        stride=stride, cin=Cin, cpad=cpad)

    # VMEM budget: scratch slabs + (double-buffered) in/out blocks + weights.
    esize = jnp.dtype(cdt).itemsize
    scratch_bytes = ((H + 2) * (W + 2 * LPAD) * Cin
                     + (Hout + 2) * (Wout + 2 * LPAD) * cpad) * esize
    block_bytes = 2 * (H * W * Cin + Hout * Wout * cpad) * esize
    weight_bytes = 2 * (9 * Cin * cpad + 9 * cpad * cpad + Cin * cpad) * esize
    vmem_limit = int(min(max(2 * (scratch_bytes + block_bytes + weight_bytes)
                             + (4 << 20), 32 << 20), 96 << 20))

    out = pl.pallas_call(
        kernel,
        out_shape=jax.ShapeDtypeStruct((N, Hout, Wout, cpad), cdt),
        grid_spec=pltpu.PrefetchScalarGridSpec(
            num_scalar_prefetch=0,
            grid=(N,),
            in_specs=[
                pl.BlockSpec((1, H, W, Cin), lambda n: (n, 0, 0, 0)),
                pl.BlockSpec((9, Cin, cpad), lambda n: (0, 0, 0)),
                pl.BlockSpec((1, cpad), lambda n: (0, 0)),
                pl.BlockSpec((1, cpad), lambda n: (0, 0)),
                pl.BlockSpec((9, cpad, cpad), lambda n: (0, 0, 0)),
                pl.BlockSpec((1, cpad), lambda n: (0, 0)),
                pl.BlockSpec((1, cpad), lambda n: (0, 0)),
                pl.BlockSpec((Cin, cpad), lambda n: (0, 0)),
                pl.BlockSpec((1, cpad), lambda n: (0, 0)),
                pl.BlockSpec((1, cpad), lambda n: (0, 0)),
            ],
            out_specs=pl.BlockSpec((1, Hout, Wout, cpad),
                                   lambda n: (n, 0, 0, 0)),
            scratch_shapes=[
                pltpu.VMEM((H + 2, W + 2 * LPAD, Cin), cdt),          # padded x
                pltpu.VMEM((Hout + 2, Wout + 2 * LPAD, cpad), cdt),   # padded y1
            ],
        ),
        compiler_params=pltpu.CompilerParams(
            dimension_semantics=("parallel",),
            vmem_limit_bytes=vmem_limit),
    )(x, w1, params["s1"], params["b1"], w2, params["s2"], params["b2"],
      wsc, params["s_sc"], params["b_sc"])
    return out[..., :out_channels]   # drop lane padding


def basic_block_forward(x_nchw, params, stride, out_channels):
    """PyTorch-interface wrapper (NCHW in / NCHW out)."""
    x = jnp.transpose(x_nchw, (0, 2, 3, 1))
    y = basic_block_forward_nhwc(x, params, stride, out_channels)
    return jnp.transpose(y, (0, 3, 1, 2))


# -----------------------------------------------------------------------------
# Parameter init (PyTorch layouts) + kernel-layout preparation (folded BN,
# per-tap weight matrices, Cout padded to a multiple of 128)
# -----------------------------------------------------------------------------
def _fold_bn(gamma, beta, mean, var, eps=1e-5):
    scale = gamma / jnp.sqrt(var + eps)
    return scale, beta - mean * scale


def init_params(key, in_c, out_c):
    ks = jax.random.split(key, 16)
    raw = {}
    raw["w1"] = 0.1 * jax.random.normal(ks[0], (out_c, in_c, 3, 3), jnp.float32)
    raw["w2"] = 0.1 * jax.random.normal(ks[1], (out_c, out_c, 3, 3), jnp.float32)
    raw["bn1"] = (1.0 + 0.1 * jax.random.normal(ks[2], (out_c,)),
                  0.1 * jax.random.normal(ks[3], (out_c,)),
                  0.1 * jax.random.normal(ks[4], (out_c,)),
                  1.0 + 0.1 * jnp.abs(jax.random.normal(ks[5], (out_c,))))
    raw["bn2"] = (1.0 + 0.1 * jax.random.normal(ks[6], (out_c,)),
                  0.1 * jax.random.normal(ks[7], (out_c,)),
                  0.1 * jax.random.normal(ks[8], (out_c,)),
                  1.0 + 0.1 * jnp.abs(jax.random.normal(ks[9], (out_c,))))
    if in_c != out_c:   # projection shortcut, mirroring the PyTorch module
        raw["w_sc"] = 0.1 * jax.random.normal(ks[10], (out_c, in_c, 1, 1),
                                              jnp.float32)
        raw["bn_sc"] = (1.0 + 0.1 * jax.random.normal(ks[11], (out_c,)),
                        0.1 * jax.random.normal(ks[12], (out_c,)),
                        0.1 * jax.random.normal(ks[13], (out_c,)),
                        1.0 + 0.1 * jnp.abs(jax.random.normal(ks[14], (out_c,))))
    return raw


def prepare_params(raw, in_c, out_c, stride):
    cpad = _round_up(out_c, LANE)

    def padc(v):  # (out_c,) -> (1, cpad), zero-padded
        return jnp.pad(v, (0, cpad - out_c)).reshape(1, cpad).astype(jnp.float32)

    p = {}
    w1 = jnp.transpose(raw["w1"], (2, 3, 1, 0)).reshape(9, in_c, out_c)
    p["w1"] = jnp.pad(w1, ((0, 0), (0, 0), (0, cpad - out_c)))
    w2 = jnp.transpose(raw["w2"], (2, 3, 1, 0)).reshape(9, out_c, out_c)
    p["w2"] = jnp.pad(w2, ((0, 0), (0, cpad - out_c), (0, cpad - out_c)))
    s1, b1 = _fold_bn(*raw["bn1"]); p["s1"], p["b1"] = padc(s1), padc(b1)
    s2, b2 = _fold_bn(*raw["bn2"]); p["s2"], p["b2"] = padc(s2), padc(b2)

    if "w_sc" in raw:
        wsc = raw["w_sc"][:, :, 0, 0].T                      # (Cin, Cout)
        p["w_sc"] = jnp.pad(wsc, ((0, 0), (0, cpad - out_c)))
        ssc, bsc = _fold_bn(*raw["bn_sc"])
        p["s_sc"], p["b_sc"] = padc(ssc), padc(bsc)
    else:
        # Identity shortcut expressed as an eye projection -> one uniform
        # kernel path. Only well-formed at stride 1 (as in the reference
        # module); a strided downsample block can still be built by providing
        # raw["w_sc"]/raw["bn_sc"] explicitly.
        assert stride == 1 and in_c == out_c, (
            "identity shortcut requires stride == 1 and in_c == out_c")
        p["w_sc"] = jnp.eye(in_c, cpad, dtype=jnp.float32)
        p["s_sc"] = padc(jnp.ones((out_c,), jnp.float32))
        p["b_sc"] = padc(jnp.zeros((out_c,), jnp.float32))
    return p


# -----------------------------------------------------------------------------
# Pure-JAX reference (same math as the PyTorch module in eval mode)
# -----------------------------------------------------------------------------
def ref_forward(x_nchw, raw, stride, eps=1e-5):
    def conv(x, w, s, pad):
        return lax.conv_general_dilated(
            x, w, (s, s), ((pad, pad), (pad, pad)),
            dimension_numbers=("NCHW", "OIHW", "NCHW"))

    def bn(x, p):
        g, b, m, v = p
        inv = g / jnp.sqrt(v + eps)
        return x * inv[None, :, None, None] + (b - m * inv)[None, :, None, None]

    y = jax.nn.relu(bn(conv(x_nchw, raw["w1"], stride, 1), raw["bn1"]))
    y = bn(conv(y, raw["w2"], 1, 1), raw["bn2"])
    if "w_sc" in raw:
        sc = bn(conv(x_nchw, raw["w_sc"], stride, 0), raw["bn_sc"])
    else:
        sc = x_nchw
    return jax.nn.relu(y + sc)


if __name__ == "__main__":
    key = jax.random.PRNGKey(0)
    k_x, k_p, k_x2, k_p2 = jax.random.split(key, 4)

    # Config 1: projection shortcut, stride 2 (Cin != Cout), f32.
    N, Cin, Cout, H, W, stride = 2, 4, 8, 16, 16, 2
    x = jax.random.normal(k_x, (N, Cin, H, W), jnp.float32)
    raw = init_params(k_p, Cin, Cout)
    params = prepare_params(raw, Cin, Cout, stride)
    out = jax.block_until_ready(basic_block_forward(x, params, stride, Cout))
    expected = jax.block_until_ready(ref_forward(x, raw, stride))
    assert out.shape == expected.shape, (out.shape, expected.shape)
    err = float(jnp.max(jnp.abs(out - expected)))
    assert err < 1e-3, f"projection-path max abs error {err}"

    # Config 2: identity shortcut, stride 1 (Cin == Cout), f32.
    N2, C2, H2, W2 = 2, 8, 8, 8
    x2 = jax.random.normal(k_x2, (N2, C2, H2, W2), jnp.float32)
    raw2 = init_params(k_p2, C2, C2)
    params2 = prepare_params(raw2, C2, C2, 1)
    out2 = jax.block_until_ready(basic_block_forward(x2, params2, 1, C2))
    expected2 = jax.block_until_ready(ref_forward(x2, raw2, 1))
    assert out2.shape == expected2.shape, (out2.shape, expected2.shape)
    err2 = float(jnp.max(jnp.abs(out2 - expected2)))
    assert err2 < 1e-3, f"identity-path max abs error {err2}"

    # Config 3: bf16 activations/weights (f32 MXU accumulation), looser tol.
    out3 = jax.block_until_ready(
        basic_block_forward(x2.astype(jnp.bfloat16), params2, 1, C2))
    err3 = float(jnp.max(jnp.abs(out3.astype(jnp.float32) - expected2)))
    assert err3 < 1e-1, f"bf16-path max abs error {err3}"

    print("KERNEL_OK")
</pallas_src>

<mosaic_0001>
module attributes {stable_mosaic.version = 11 : i64} {
  func.func @_basic_block_kernel(%arg0: i32, %arg1: memref<1x16x16x4xf32, #tpu.memory_space<vmem>>, %arg2: memref<9x4x128xf32, #tpu.memory_space<vmem>>, %arg3: memref<1x128xf32, #tpu.memory_space<vmem>>, %arg4: memref<1x128xf32, #tpu.memory_space<vmem>>, %arg5: memref<9x128x128xf32, #tpu.memory_space<vmem>>, %arg6: memref<1x128xf32, #tpu.memory_space<vmem>>, %arg7: memref<1x128xf32, #tpu.memory_space<vmem>>, %arg8: memref<4x128xf32, #tpu.memory_space<vmem>>, %arg9: memref<1x128xf32, #tpu.memory_space<vmem>>, %arg10: memref<1x128xf32, #tpu.memory_space<vmem>>, %arg11: memref<1x8x8x128xf32, #tpu.memory_space<vmem>>, %arg12: memref<18x32x4xf32, #tpu.memory_space<vmem>>, %arg13: memref<10x24x128xf32, #tpu.memory_space<vmem>>) attributes {dimension_semantics = [#tpu.dimension_semantics<parallel>], iteration_bounds = array<i64: 2>, scalar_prefetch = 0 : i64, scratch_operands = 2 : i64, tpu.core_type = #tpu.core_type<tc>, window_params = [{transform_indices = @transform_0, window_bounds = array<i64: 1, 16, 16, 4>}, {pipeline_mode = #tpu.pipeline_mode<synchronous>, transform_indices = @transform_1, window_bounds = array<i64: 9, 4, 128>}, {pipeline_mode = #tpu.pipeline_mode<synchronous>, transform_indices = @transform_2, window_bounds = array<i64: 1, 128>}, {pipeline_mode = #tpu.pipeline_mode<synchronous>, transform_indices = @transform_3, window_bounds = array<i64: 1, 128>}, {pipeline_mode = #tpu.pipeline_mode<synchronous>, transform_indices = @transform_4, window_bounds = array<i64: 9, 128, 128>}, {pipeline_mode = #tpu.pipeline_mode<synchronous>, transform_indices = @transform_5, window_bounds = array<i64: 1, 128>}, {pipeline_mode = #tpu.pipeline_mode<synchronous>, transform_indices = @transform_6, window_bounds = array<i64: 1, 128>}, {pipeline_mode = #tpu.pipeline_mode<synchronous>, transform_indices = @transform_7, window_bounds = array<i64: 4, 128>}, {pipeline_mode = #tpu.pipeline_mode<synchronous>, transform_indices = @transform_8, window_bounds = array<i64: 1, 128>}, {pipeline_mode = #tpu.pipeline_mode<synchronous>, transform_indices = @transform_9, window_bounds = array<i64: 1, 128>}, {transform_indices = @transform_10, window_bounds = array<i64: 1, 8, 8, 128>}]} {
    %c0 = arith.constant 0 : index
    %c0_0 = arith.constant 0 : index
    %c0_1 = arith.constant 0 : index
    %c0_2 = arith.constant 0 : index
    %0 = vector.load %arg1[%c0, %c0_0, %c0_1, %c0_2] : memref<1x16x16x4xf32, #tpu.memory_space<vmem>>, vector<1x16x16x4xf32>
    %1 = vector.shape_cast %0 : vector<1x16x16x4xf32> to vector<16x16x4xf32>
    %c1 = arith.constant 1 : index
    %c8 = arith.constant 8 : index
    %c0_3 = arith.constant 0 : index
    %2 = vector.load %arg12[%c1, %c8, %c0_3] : memref<18x32x4xf32, #tpu.memory_space<vmem>>, vector<16x16x4xf32>
    tpu.vector_store %arg12[%c1, %c8, %c0_3], %1 {strides = array<i32>} : memref<18x32x4xf32, #tpu.memory_space<vmem>>, vector<16x16x4xf32>,
    %cst = arith.constant 0.000000e+00 : f32
    %3 = vector.broadcast %cst : f32 to vector<1x32x4xf32>
    %c0_4 = arith.constant 0 : index
    %c0_5 = arith.constant 0 : index
    %c0_6 = arith.constant 0 : index
    %4 = vector.load %arg12[%c0_4, %c0_5, %c0_6] : memref<18x32x4xf32, #tpu.memory_space<vmem>>, vector<1x32x4xf32>
    tpu.vector_store %arg12[%c0_4, %c0_5, %c0_6], %3 {strides = array<i32>} : memref<18x32x4xf32, #tpu.memory_space<vmem>>, vector<1x32x4xf32>,
    %cst_7 = arith.constant 0.000000e+00 : f32
    %5 = vector.broadcast %cst_7 : f32 to vector<1x32x4xf32>
    %c17 = arith.constant 17 : index
    %c0_8 = arith.constant 0 : index
    %c0_9 = arith.constant 0 : index
    %6 = vector.load %arg12[%c17, %c0_8, %c0_9] : memref<18x32x4xf32, #tpu.memory_space<vmem>>, vector<1x32x4xf32>
    tpu.vector_store %arg12[%c17, %c0_8, %c0_9], %5 {strides = array<i32>} : memref<18x32x4xf32, #tpu.memory_space<vmem>>, vector<1x32x4xf32>,
    %cst_10 = arith.constant 0.000000e+00 : f32
    %7 = vector.broadcast %cst_10 : f32 to vector<16x1x4xf32>
    %c1_11 = arith.constant 1 : index
    %c7 = arith.constant 7 : index
    %c0_12 = arith.constant 0 : index
    %8 = vector.load %arg12[%c1_11, %c7, %c0_12] : memref<18x32x4xf32, #tpu.memory_space<vmem>>, vector<16x1x4xf32>
    tpu.vector_store %arg12[%c1_11, %c7, %c0_12], %7 {strides = array<i32>} : memref<18x32x4xf32, #tpu.memory_space<vmem>>, vector<16x1x4xf32>,
    %cst_13 = arith.constant 0.000000e+00 : f32
    %9 = vector.broadcast %cst_13 : f32 to vector<16x1x4xf32>
    %c1_14 = arith.constant 1 : index
    %c24 = arith.constant 24 : index
    %c0_15 = arith.constant 0 : index
    %10 = vector.load %arg12[%c1_14, %c24, %c0_15] : memref<18x32x4xf32, #tpu.memory_space<vmem>>, vector<16x1x4xf32>
    tpu.vector_store %arg12[%c1_14, %c24, %c0_15], %9 {strides = array<i32>} : memref<18x32x4xf32, #tpu.memory_space<vmem>>, vector<16x1x4xf32>,
    %c0_16 = arith.constant 0 : index
    %c7_17 = arith.constant 7 : index
    %c0_18 = arith.constant 0 : index
    %11 = tpu.strided_load %arg12[%c0_16, %c7_17, %c0_18] {strides = array<i32: 2, 2, 1>} : memref<18x32x4xf32, #tpu.memory_space<vmem>>, vector<8x8x4xf32>
    %12 = vector.shape_cast %11 : vector<8x8x4xf32> to vector<64x4xf32>
    %c0_19 = arith.constant 0 : index
    %c0_20 = arith.constant 0 : index
    %c0_21 = arith.constant 0 : index
    %13 = vector.load %arg2[%c0_19, %c0_20, %c0_21] : memref<9x4x128xf32, #tpu.memory_space<vmem>>, vector<1x4x128xf32>
    %14 = vector.shape_cast %13 : vector<1x4x128xf32> to vector<4x128xf32>
    %cst_22 = arith.constant dense<0.000000e+00> : vector<64x128xf32>
    %15 = tpu.matmul %12, %14, %cst_22 {dimension_numbers = #tpu.dot_dimension_numbers<[1], [0], [0], [1], [0, 0, 1, 1], [], []>} : vector<64x4xf32>, vector<4x128xf32>, vector<64x128xf32> -> vector<64x128xf32>
    %c0_23 = arith.constant 0 : index
    %c8_24 = arith.constant 8 : index
    %c0_25 = arith.constant 0 : index
    %16 = tpu.strided_load %arg12[%c0_23, %c8_24, %c0_25] {strides = array<i32: 2, 2, 1>} : memref<18x32x4xf32, #tpu.memory_space<vmem>>, vector<8x8x4xf32>
    %17 = vector.shape_cast %16 : vector<8x8x4xf32> to vector<64x4xf32>
    %c1_26 = arith.constant 1 : index
    %c0_27 = arith.constant 0 : index
    %c0_28 = arith.constant 0 : index
    %18 = vector.load %arg2[%c1_26, %c0_27, %c0_28] : memref<9x4x128xf32, #tpu.memory_space<vmem>>, vector<1x4x128xf32>
    %19 = vector.shape_cast %18 : vector<1x4x128xf32> to vector<4x128xf32>
    %cst_29 = arith.constant dense<0.000000e+00> : vector<64x128xf32>
    %20 = tpu.matmul %17, %19, %cst_29 {dimension_numbers = #tpu.dot_dimension_numbers<[1], [0], [0], [1], [0, 0, 1, 1], [], []>} : vector<64x4xf32>, vector<4x128xf32>, vector<64x128xf32> -> vector<64x128xf32>
    %21 = arith.addf %15, %20 : vector<64x128xf32>
    %c0_30 = arith.constant 0 : index
    %c9 = arith.constant 9 : index
    %c0_31 = arith.constant 0 : index
    %22 = tpu.strided_load %arg12[%c0_30, %c9, %c0_31] {strides = array<i32: 2, 2, 1>} : memref<18x32x4xf32, #tpu.memory_space<vmem>>, vector<8x8x4xf32>
    %23 = vector.shape_cast %22 : vector<8x8x4xf32> to vector<64x4xf32>
    %c2 = arith.constant 2 : index
    %c0_32 = arith.constant 0 : index
    %c0_33 = arith.constant 0 : index
    %24 = vector.load %arg2[%c2, %c0_32, %c0_33] : memref<9x4x128xf32, #tpu.memory_space<vmem>>, vector<1x4x128xf32>
    %25 = vector.shape_cast %24 : vector<1x4x128xf32> to vector<4x128xf32>
    %cst_34 = arith.constant dense<0.000000e+00> : vector<64x128xf32>
    %26 = tpu.matmul %23, %25, %cst_34 {dimension_numbers = #tpu.dot_dimension_numbers<[1], [0], [0], [1], [0, 0, 1, 1], [], []>} : vector<64x4xf32>, vector<4x128xf32>, vector<64x128xf32> -> vector<64x128xf32>
    %27 = arith.addf %21, %26 : vector<64x128xf32>
    %c1_35 = arith.constant 1 : index
    %c7_36 = arith.constant 7 : index
    %c0_37 = arith.constant 0 : index
    %28 = tpu.strided_load %arg12[%c1_35, %c7_36, %c0_37] {strides = array<i32: 2, 2, 1>} : memref<18x32x4xf32, #tpu.memory_space<vmem>>, vector<8x8x4xf32>
    %29 = vector.shape_cast %28 : vector<8x8x4xf32> to vector<64x4xf32>
    %c3 = arith.constant 3 : index
    %c0_38 = arith.constant 0 : index
    %c0_39 = arith.constant 0 : index
    %30 = vector.load %arg2[%c3, %c0_38, %c0_39] : memref<9x4x128xf32, #tpu.memory_space<vmem>>, vector<1x4x128xf32>
    %31 = vector.shape_cast %30 : vector<1x4x128xf32> to vector<4x128xf32>
    %cst_40 = arith.constant dense<0.000000e+00> : vector<64x128xf32>
    %32 = tpu.matmul %29, %31, %cst_40 {dimension_numbers = #tpu.dot_dimension_numbers<[1], [0], [0], [1], [0, 0, 1, 1], [], []>} : vector<64x4xf32>, vector<4x128xf32>, vector<64x128xf32> -> vector<64x128xf32>
    %33 = arith.addf %27, %32 : vector<64x128xf32>
    %c1_41 = arith.constant 1 : index
    %c8_42 = arith.constant 8 : index
    %c0_43 = arith.constant 0 : index
    %34 = tpu.strided_load %arg12[%c1_41, %c8_42, %c0_43] {strides = array<i32: 2, 2, 1>} : memref<18x32x4xf32, #tpu.memory_space<vmem>>, vector<8x8x4xf32>
    %35 = vector.shape_cast %34 : vector<8x8x4xf32> to vector<64x4xf32>
    %c4 = arith.constant 4 : index
    %c0_44 = arith.constant 0 : index
    %c0_45 = arith.constant 0 : index
    %36 = vector.load %arg2[%c4, %c0_44, %c0_45] : memref<9x4x128xf32, #tpu.memory_space<vmem>>, vector<1x4x128xf32>
    %37 = vector.shape_cast %36 : vector<1x4x128xf32> to vector<4x128xf32>
    %cst_46 = arith.constant dense<0.000000e+00> : vector<64x128xf32>
    %38 = tpu.matmul %35, %37, %cst_46 {dimension_numbers = #tpu.dot_dimension_numbers<[1], [0], [0], [1], [0, 0, 1, 1], [], []>} : vector<64x4xf32>, vector<4x128xf32>, vector<64x128xf32> -> vector<64x128xf32>
    %39 = arith.addf %33, %38 : vector<64x128xf32>
    %c1_47 = arith.constant 1 : index
    %c9_48 = arith.constant 9 : index
    %c0_49 = arith.constant 0 : index
    %40 = tpu.strided_load %arg12[%c1_47, %c9_48, %c0_49] {strides = array<i32: 2, 2, 1>} : memref<18x32x4xf32, #tpu.memory_space<vmem>>, vector<8x8x4xf32>
    %41 = vector.shape_cast %40 : vector<8x8x4xf32> to vector<64x4xf32>
    %c5 = arith.constant 5 : index
    %c0_50 = arith.constant 0 : index
    %c0_51 = arith.constant 0 : index
    %42 = vector.load %arg2[%c5, %c0_50, %c0_51] : memref<9x4x128xf32, #tpu.memory_space<vmem>>, vector<1x4x128xf32>
    %43 = vector.shape_cast %42 : vector<1x4x128xf32> to vector<4x128xf32>
    %cst_52 = arith.constant dense<0.000000e+00> : vector<64x128xf32>
    %44 = tpu.matmul %41, %43, %cst_52 {dimension_numbers = #tpu.dot_dimension_numbers<[1], [0], [0], [1], [0, 0, 1, 1], [], []>} : vector<64x4xf32>, vector<4x128xf32>, vector<64x128xf32> -> vector<64x128xf32>
    %45 = arith.addf %39, %44 : vector<64x128xf32>
    %c2_53 = arith.constant 2 : index
    %c7_54 = arith.constant 7 : index
    %c0_55 = arith.constant 0 : index
    %46 = tpu.strided_load %arg12[%c2_53, %c7_54, %c0_55] {strides = array<i32: 2, 2, 1>} : memref<18x32x4xf32, #tpu.memory_space<vmem>>, vector<8x8x4xf32>
    %47 = vector.shape_cast %46 : vector<8x8x4xf32> to vector<64x4xf32>
    %c6 = arith.constant 6 : index
    %c0_56 = arith.constant 0 : index
    %c0_57 = arith.constant 0 : index
    %48 = vector.load %arg2[%c6, %c0_56, %c0_57] : memref<9x4x128xf32, #tpu.memory_space<vmem>>, vector<1x4x128xf32>
    %49 = vector.shape_cast %48 : vector<1x4x128xf32> to vector<4x128xf32>
    %cst_58 = arith.constant dense<0.000000e+00> : vector<64x128xf32>
    %50 = tpu.matmul %47, %49, %cst_58 {dimension_numbers = #tpu.dot_dimension_numbers<[1], [0], [0], [1], [0, 0, 1, 1], [], []>} : vector<64x4xf32>, vector<4x128xf32>, vector<64x128xf32> -> vector<64x128xf32>
    %51 = arith.addf %45, %50 : vector<64x128xf32>
    %c2_59 = arith.constant 2 : index
    %c8_60 = arith.constant 8 : index
    %c0_61 = arith.constant 0 : index
    %52 = tpu.strided_load %arg12[%c2_59, %c8_60, %c0_61] {strides = array<i32: 2, 2, 1>} : memref<18x32x4xf32, #tpu.memory_space<vmem>>, vector<8x8x4xf32>
    %53 = vector.shape_cast %52 : vector<8x8x4xf32> to vector<64x4xf32>
    %c7_62 = arith.constant 7 : index
    %c0_63 = arith.constant 0 : index
    %c0_64 = arith.constant 0 : index
    %54 = vector.load %arg2[%c7_62, %c0_63, %c0_64] : memref<9x4x128xf32, #tpu.memory_space<vmem>>, vector<1x4x128xf32>
    %55 = vector.shape_cast %54 : vector<1x4x128xf32> to vector<4x128xf32>
    %cst_65 = arith.constant dense<0.000000e+00> : vector<64x128xf32>
    %56 = tpu.matmul %53, %55, %cst_65 {dimension_numbers = #tpu.dot_dimension_numbers<[1], [0], [0], [1], [0, 0, 1, 1], [], []>} : vector<64x4xf32>, vector<4x128xf32>, vector<64x128xf32> -> vector<64x128xf32>
    %57 = arith.addf %51, %56 : vector<64x128xf32>
    %c2_66 = arith.constant 2 : index
    %c9_67 = arith.constant 9 : index
    %c0_68 = arith.constant 0 : index
    %58 = tpu.strided_load %arg12[%c2_66, %c9_67, %c0_68] {strides = array<i32: 2, 2, 1>} : memref<18x32x4xf32, #tpu.memory_space<vmem>>, vector<8x8x4xf32>
    %59 = vector.shape_cast %58 : vector<8x8x4xf32> to vector<64x4xf32>
    %c8_69 = arith.constant 8 : index
    %c0_70 = arith.constant 0 : index
    %c0_71 = arith.constant 0 : index
    %60 = vector.load %arg2[%c8_69, %c0_70, %c0_71] : memref<9x4x128xf32, #tpu.memory_space<vmem>>, vector<1x4x128xf32>
    %61 = vector.shape_cast %60 : vector<1x4x128xf32> to vector<4x128xf32>
    %cst_72 = arith.constant dense<0.000000e+00> : vector<64x128xf32>
    %62 = tpu.matmul %59, %61, %cst_72 {dimension_numbers = #tpu.dot_dimension_numbers<[1], [0], [0], [1], [0, 0, 1, 1], [], []>} : vector<64x4xf32>, vector<4x128xf32>, vector<64x128xf32> -> vector<64x128xf32>
    %63 = arith.addf %57, %62 : vector<64x128xf32>
    %c0_73 = arith.constant 0 : index
    %c0_74 = arith.constant 0 : index
    %64 = vector.load %arg3[%c0_73, %c0_74] : memref<1x128xf32, #tpu.memory_space<vmem>>, vector<1x128xf32>
    %65 = vector.broadcast %64 : vector<1x128xf32> to vector<64x128xf32>
    %66 = arith.mulf %63, %65 : vector<64x128xf32>
    %c0_75 = arith.constant 0 : index
    %c0_76 = arith.constant 0 : index
    %67 = vector.load %arg4[%c0_75, %c0_76] : memref<1x128xf32, #tpu.memory_space<vmem>>, vector<1x128xf32>
    %68 = vector.broadcast %67 : vector<1x128xf32> to vector<64x128xf32>
    %69 = arith.addf %66, %68 : vector<64x128xf32>
    %cst_77 = arith.constant 0.000000e+00 : f32
    %70 = vector.broadcast %cst_77 : f32 to vector<64x128xf32>
    %71 = arith.maximumf %69, %70 : vector<64x128xf32>
    %72 = vector.shape_cast %71 : vector<64x128xf32> to vector<8x8x128xf32>
    %c1_78 = arith.constant 1 : index
    %c8_79 = arith.constant 8 : index
    %c0_80 = arith.constant 0 : index
    %73 = vector.load %arg13[%c1_78, %c8_79, %c0_80] : memref<10x24x128xf32, #tpu.memory_space<vmem>>, vector<8x8x128xf32>
    tpu.vector_store %arg13[%c1_78, %c8_79, %c0_80], %72 {strides = array<i32>} : memref<10x24x128xf32, #tpu.memory_space<vmem>>, vector<8x8x128xf32>,
    %cst_81 = arith.constant 0.000000e+00 : f32
    %74 = vector.broadcast %cst_81 : f32 to vector<1x24x128xf32>
    %c0_82 = arith.constant 0 : index
    %c0_83 = arith.constant 0 : index
    %c0_84 = arith.constant 0 : index
    %75 = vector.load %arg13[%c0_82, %c0_83, %c0_84] : memref<10x24x128xf32, #tpu.memory_space<vmem>>, vector<1x24x128xf32>
    tpu.vector_store %arg13[%c0_82, %c0_83, %c0_84], %74 {strides = array<i32>} : memref<10x24x128xf32, #tpu.memory_space<vmem>>, vector<1x24x128xf32>,
    %cst_85 = arith.constant 0.000000e+00 : f32
    %76 = vector.broadcast %cst_85 : f32 to vector<1x24x128xf32>
    %c9_86 = arith.constant 9 : index
    %c0_87 = arith.constant 0 : index
    %c0_88 = arith.constant 0 : index
    %77 = vector.load %arg13[%c9_86, %c0_87, %c0_88] : memref<10x24x128xf32, #tpu.memory_space<vmem>>, vector<1x24x128xf32>
    tpu.vector_store %arg13[%c9_86, %c0_87, %c0_88], %76 {strides = array<i32>} : memref<10x24x128xf32, #tpu.memory_space<vmem>>, vector<1x24x128xf32>,
    %cst_89 = arith.constant 0.000000e+00 : f32
    %78 = vector.broadcast %cst_89 : f32 to vector<8x1x128xf32>
    %c1_90 = arith.constant 1 : index
    %c7_91 = arith.constant 7 : index
    %c0_92 = arith.constant 0 : index
    %79 = vector.load %arg13[%c1_90, %c7_91, %c0_92] : memref<10x24x128xf32, #tpu.memory_space<vmem>>, vector<8x1x128xf32>
    tpu.vector_store %arg13[%c1_90, %c7_91, %c0_92], %78 {strides = array<i32>} : memref<10x24x128xf32, #tpu.memory_space<vmem>>, vector<8x1x128xf32>,
    %cst_93 = arith.constant 0.000000e+00 : f32
    %80 = vector.broadcast %cst_93 : f32 to vector<8x1x128xf32>
    %c1_94 = arith.constant 1 : index
    %c16 = arith.constant 16 : index
    %c0_95 = arith.constant 0 : index
    %81 = vector.load %arg13[%c1_94, %c16, %c0_95] : memref<10x24x128xf32, #tpu.memory_space<vmem>>, vector<8x1x128xf32>
    tpu.vector_store %arg13[%c1_94, %c16, %c0_95], %80 {strides = array<i32>} : memref<10x24x128xf32, #tpu.memory_space<vmem>>, vector<8x1x128xf32>,
    %c0_96 = arith.constant 0 : index
    %c7_97 = arith.constant 7 : index
    %c0_98 = arith.constant 0 : index
    %82 = vector.load %arg13[%c0_96, %c7_97, %c0_98] : memref<10x24x128xf32, #tpu.memory_space<vmem>>, vector<8x8x128xf32>
    %83 = vector.shape_cast %82 : vector<8x8x128xf32> to vector<64x128xf32>
    %c0_99 = arith.constant 0 : index
    %c0_100 = arith.constant 0 : index
    %c0_101 = arith.constant 0 : index
    %84 = vector.load %arg5[%c0_99, %c0_100, %c0_101] : memref<9x128x128xf32, #tpu.memory_space<vmem>>, vector<1x128x128xf32>
    %85 = vector.shape_cast %84 : vector<1x128x128xf32> to vector<128x128xf32>
    %cst_102 = arith.constant dense<0.000000e+00> : vector<64x128xf32>
    %86 = tpu.matmul %83, %85, %cst_102 {dimension_numbers = #tpu.dot_dimension_numbers<[1], [0], [0], [1], [0, 0, 1, 1], [], []>} : vector<64x128xf32>, vector<128x128xf32>, vector<64x128xf32> -> vector<64x128xf32>
    %c0_103 = arith.constant 0 : index
    %c8_104 = arith.constant 8 : index
    %c0_105 = arith.constant 0 : index
    %87 = vector.load %arg13[%c0_103, %c8_104, %c0_105] : memref<10x24x128xf32, #tpu.memory_space<vmem>>, vector<8x8x128xf32>
    %88 = vector.shape_cast %87 : vector<8x8x128xf32> to vector<64x128xf32>
    %c1_106 = arith.constant 1 : index
    %c0_107 = arith.constant 0 : index
    %c0_108 = arith.constant 0 : index
    %89 = vector.load %arg5[%c1_106, %c0_107, %c0_108] : memref<9x128x128xf32, #tpu.memory_space<vmem>>, vector<1x128x128xf32>
    %90 = vector.shape_cast %89 : vector<1x128x128xf32> to vector<128x128xf32>
    %cst_109 = arith.constant dense<0.000000e+00> : vector<64x128xf32>
    %91 = tpu.matmul %88, %90, %cst_109 {dimension_numbers = #tpu.dot_dimension_numbers<[1], [0], [0], [1], [0, 0, 1, 1], [], []>} : vector<64x128xf32>, vector<128x128xf32>, vector<64x128xf32> -> vector<64x128xf32>
    %92 = arith.addf %86, %91 : vector<64x128xf32>
    %c0_110 = arith.constant 0 : index
    %c9_111 = arith.constant 9 : index
    %c0_112 = arith.constant 0 : index
    %93 = vector.load %arg13[%c0_110, %c9_111, %c0_112] : memref<10x24x128xf32, #tpu.memory_space<vmem>>, vector<8x8x128xf32>
    %94 = vector.shape_cast %93 : vector<8x8x128xf32> to vector<64x128xf32>
    %c2_113 = arith.constant 2 : index
    %c0_114 = arith.constant 0 : index
    %c0_115 = arith.constant 0 : index
    %95 = vector.load %arg5[%c2_113, %c0_114, %c0_115] : memref<9x128x128xf32, #tpu.memory_space<vmem>>, vector<1x128x128xf32>
    %96 = vector.shape_cast %95 : vector<1x128x128xf32> to vector<128x128xf32>
    %cst_116 = arith.constant dense<0.000000e+00> : vector<64x128xf32>
    %97 = tpu.matmul %94, %96, %cst_116 {dimension_numbers = #tpu.dot_dimension_numbers<[1], [0], [0], [1], [0, 0, 1, 1], [], []>} : vector<64x128xf32>, vector<128x128xf32>, vector<64x128xf32> -> vector<64x128xf32>
    %98 = arith.addf %92, %97 : vector<64x128xf32>
    %c1_117 = arith.constant 1 : index
    %c7_118 = arith.constant 7 : index
    %c0_119 = arith.constant 0 : index
    %99 = vector.load %arg13[%c1_117, %c7_118, %c0_119] : memref<10x24x128xf32, #tpu.memory_space<vmem>>, vector<8x8x128xf32>
    %100 = vector.shape_cast %99 : vector<8x8x128xf32> to vector<64x128xf32>
    %c3_120 = arith.constant 3 : index
    %c0_121 = arith.constant 0 : index
    %c0_122 = arith.constant 0 : index
    %101 = vector.load %arg5[%c3_120, %c0_121, %c0_122] : memref<9x128x128xf32, #tpu.memory_space<vmem>>, vector<1x128x128xf32>
    %102 = vector.shape_cast %101 : vector<1x128x128xf32> to vector<128x128xf32>
    %cst_123 = arith.constant dense<0.000000e+00> : vector<64x128xf32>
    %103 = tpu.matmul %100, %102, %cst_123 {dimension_numbers = #tpu.dot_dimension_numbers<[1], [0], [0], [1], [0, 0, 1, 1], [], []>} : vector<64x128xf32>, vector<128x128xf32>, vector<64x128xf32> -> vector<64x128xf32>
    %104 = arith.addf %98, %103 : vector<64x128xf32>
    %c1_124 = arith.constant 1 : index
    %c8_125 = arith.constant 8 : index
    %c0_126 = arith.constant 0 : index
    %105 = vector.load %arg13[%c1_124, %c8_125, %c0_126] : memref<10x24x128xf32, #tpu.memory_space<vmem>>, vector<8x8x128xf32>
    %106 = vector.shape_cast %105 : vector<8x8x128xf32> to vector<64x128xf32>
    %c4_127 = arith.constant 4 : index
    %c0_128 = arith.constant 0 : index
    %c0_129 = arith.constant 0 : index
    %107 = vector.load %arg5[%c4_127, %c0_128, %c0_129] : memref<9x128x128xf32, #tpu.memory_space<vmem>>, vector<1x128x128xf32>
    %108 = vector.shape_cast %107 : vector<1x128x128xf32> to vector<128x128xf32>
    %cst_130 = arith.constant dense<0.000000e+00> : vector<64x128xf32>
    %109 = tpu.matmul %106, %108, %cst_130 {dimension_numbers = #tpu.dot_dimension_numbers<[1], [0], [0], [1], [0, 0, 1, 1], [], []>} : vector<64x128xf32>, vector<128x128xf32>, vector<64x128xf32> -> vector<64x128xf32>
    %110 = arith.addf %104, %109 : vector<64x128xf32>
    %c1_131 = arith.constant 1 : index
    %c9_132 = arith.constant 9 : index
    %c0_133 = arith.constant 0 : index
    %111 = vector.load %arg13[%c1_131, %c9_132, %c0_133] : memref<10x24x128xf32, #tpu.memory_space<vmem>>, vector<8x8x128xf32>
    %112 = vector.shape_cast %111 : vector<8x8x128xf32> to vector<64x128xf32>
    %c5_134 = arith.constant 5 : index
    %c0_135 = arith.constant 0 : index
    %c0_136 = arith.constant 0 : index
    %113 = vector.load %arg5[%c5_134, %c0_135, %c0_136] : memref<9x128x128xf32, #tpu.memory_space<vmem>>, vector<1x128x128xf32>
    %114 = vector.shape_cast %113 : vector<1x128x128xf32> to vector<128x128xf32>
    %cst_137 = arith.constant dense<0.000000e+00> : vector<64x128xf32>
    %115 = tpu.matmul %112, %114, %cst_137 {dimension_numbers = #tpu.dot_dimension_numbers<[1], [0], [0], [1], [0, 0, 1, 1], [], []>} : vector<64x128xf32>, vector<128x128xf32>, vector<64x128xf32> -> vector<64x128xf32>
    %116 = arith.addf %110, %115 : vector<64x128xf32>
    %c2_138 = arith.constant 2 : index
    %c7_139 = arith.constant 7 : index
    %c0_140 = arith.constant 0 : index
    %117 = vector.load %arg13[%c2_138, %c7_139, %c0_140] : memref<10x24x128xf32, #tpu.memory_space<vmem>>, vector<8x8x128xf32>
    %118 = vector.shape_cast %117 : vector<8x8x128xf32> to vector<64x128xf32>
    %c6_141 = arith.constant 6 : index
    %c0_142 = arith.constant 0 : index
    %c0_143 = arith.constant 0 : index
    %119 = vector.load %arg5[%c6_141, %c0_142, %c0_143] : memref<9x128x128xf32, #tpu.memory_space<vmem>>, vector<1x128x128xf32>
    %120 = vector.shape_cast %119 : vector<1x128x128xf32> to vector<128x128xf32>
    %cst_144 = arith.constant dense<0.000000e+00> : vector<64x128xf32>
    %121 = tpu.matmul %118, %120, %cst_144 {dimension_numbers = #tpu.dot_dimension_numbers<[1], [0], [0], [1], [0, 0, 1, 1], [], []>} : vector<64x128xf32>, vector<128x128xf32>, vector<64x128xf32> -> vector<64x128xf32>
    %122 = arith.addf %116, %121 : vector<64x128xf32>
    %c2_145 = arith.constant 2 : index
    %c8_146 = arith.constant 8 : index
    %c0_147 = arith.constant 0 : index
    %123 = vector.load %arg13[%c2_145, %c8_146, %c0_147] : memref<10x24x128xf32, #tpu.memory_space<vmem>>, vector<8x8x128xf32>
    %124 = vector.shape_cast %123 : vector<8x8x128xf32> to vector<64x128xf32>
    %c7_148 = arith.constant 7 : index
    %c0_149 = arith.constant 0 : index
    %c0_150 = arith.constant 0 : index
    %125 = vector.load %arg5[%c7_148, %c0_149, %c0_150] : memref<9x128x128xf32, #tpu.memory_space<vmem>>, vector<1x128x128xf32>
    %126 = vector.shape_cast %125 : vector<1x128x128xf32> to vector<128x128xf32>
    %cst_151 = arith.constant dense<0.000000e+00> : vector<64x128xf32>
    %127 = tpu.matmul %124, %126, %cst_151 {dimension_numbers = #tpu.dot_dimension_numbers<[1], [0], [0], [1], [0, 0, 1, 1], [], []>} : vector<64x128xf32>, vector<128x128xf32>, vector<64x128xf32> -> vector<64x128xf32>
    %128 = arith.addf %122, %127 : vector<64x128xf32>
    %c2_152 = arith.constant 2 : index
    %c9_153 = arith.constant 9 : index
    %c0_154 = arith.constant 0 : index
    %129 = vector.load %arg13[%c2_152, %c9_153, %c0_154] : memref<10x24x128xf32, #tpu.memory_space<vmem>>, vector<8x8x128xf32>
    %130 = vector.shape_cast %129 : vector<8x8x128xf32> to vector<64x128xf32>
    %c8_155 = arith.constant 8 : index
    %c0_156 = arith.constant 0 : index
    %c0_157 = arith.constant 0 : index
    %131 = vector.load %arg5[%c8_155, %c0_156, %c0_157] : memref<9x128x128xf32, #tpu.memory_space<vmem>>, vector<1x128x128xf32>
    %132 = vector.shape_cast %131 : vector<1x128x128xf32> to vector<128x128xf32>
    %cst_158 = arith.constant dense<0.000000e+00> : vector<64x128xf32>
    %133 = tpu.matmul %130, %132, %cst_158 {dimension_numbers = #tpu.dot_dimension_numbers<[1], [0], [0], [1], [0, 0, 1, 1], [], []>} : vector<64x128xf32>, vector<128x128xf32>, vector<64x128xf32> -> vector<64x128xf32>
    %134 = arith.addf %128, %133 : vector<64x128xf32>
    %c0_159 = arith.constant 0 : index
    %c0_160 = arith.constant 0 : index
    %135 = vector.load %arg6[%c0_159, %c0_160] : memref<1x128xf32, #tpu.memory_space<vmem>>, vector<1x128xf32>
    %136 = vector.broadcast %135 : vector<1x128xf32> to vector<64x128xf32>
    %137 = arith.mulf %134, %136 : vector<64x128xf32>
    %c0_161 = arith.constant 0 : index
    %c0_162 = arith.constant 0 : index
    %138 = vector.load %arg7[%c0_161, %c0_162] : memref<1x128xf32, #tpu.memory_space<vmem>>, vector<1x128xf32>
    %139 = vector.broadcast %138 : vector<1x128xf32> to vector<64x128xf32>
    %140 = arith.addf %137, %139 : vector<64x128xf32>
    %c0_163 = arith.constant 0 : index
    %c0_164 = arith.constant 0 : index
    %141 = vector.load %arg8[%c0_163, %c0_164] : memref<4x128xf32, #tpu.memory_space<vmem>>, vector<4x128xf32>
    %cst_165 = arith.constant dense<0.000000e+00> : vector<64x128xf32>
    %142 = tpu.matmul %35, %141, %cst_165 {dimension_numbers = #tpu.dot_dimension_numbers<[1], [0], [0], [1], [0, 0, 1, 1], [], []>} : vector<64x4xf32>, vector<4x128xf32>, vector<64x128xf32> -> vector<64x128xf32>
    %c0_166 = arith.constant 0 : index
    %c0_167 = arith.constant 0 : index
    %143 = vector.load %arg9[%c0_166, %c0_167] : memref<1x128xf32, #tpu.memory_space<vmem>>, vector<1x128xf32>
    %144 = vector.broadcast %143 : vector<1x128xf32> to vector<64x128xf32>
    %145 = arith.mulf %142, %144 : vector<64x128xf32>
    %c0_168 = arith.constant 0 : index
    %c0_169 = arith.constant 0 : index
    %146 = vector.load %arg10[%c0_168, %c0_169] : memref<1x128xf32, #tpu.memory_space<vmem>>, vector<1x128xf32>
    %147 = vector.broadcast %146 : vector<1x128xf32> to vector<64x128xf32>
    %148 = arith.addf %145, %147 : vector<64x128xf32>
    %149 = arith.addf %140, %148 : vector<64x128xf32>
    %cst_170 = arith.constant 0.000000e+00 : f32
    %150 = vector.broadcast %cst_170 : f32 to vector<64x128xf32>
    %151 = arith.maximumf %149, %150 : vector<64x128xf32>
    %152 = vector.shape_cast %151 : vector<64x128xf32> to vector<1x8x8x128xf32>
    %c0_171 = arith.constant 0 : index
    %c0_172 = arith.constant 0 : index
    %c0_173 = arith.constant 0 : index
    %c0_174 = arith.constant 0 : index
    %153 = vector.load %arg11[%c0_171, %c0_172, %c0_173, %c0_174] : memref<1x8x8x128xf32, #tpu.memory_space<vmem>>, vector<1x8x8x128xf32>
    tpu.vector_store %arg11[%c0_171, %c0_172, %c0_173, %c0_174], %152 {strides = array<i32>} : memref<1x8x8x128xf32, #tpu.memory_space<vmem>>, vector<1x8x8x128xf32>,
    return
  }
  func.func @transform_0(%arg0: i32) -> (i32, i32, i32, i32) {
    %c0_i32 = arith.constant 0 : i32
    %c0_i32_0 = arith.constant 0 : i32
    %c0_i32_1 = arith.constant 0 : i32
    %c0_i32_2 = arith.constant 0 : i32
    return %arg0, %c0_i32, %c0_i32_0, %c0_i32_1 : i32, i32, i32, i32
  }
  func.func @transform_1(%arg0: i32) -> (i32, i32, i32) {
    %c0_i32 = arith.constant 0 : i32
    %c0_i32_0 = arith.constant 0 : i32
    %c0_i32_1 = arith.constant 0 : i32
    %c0_i32_2 = arith.constant 0 : i32
    return %c0_i32, %c0_i32_0, %c0_i32_1 : i32, i32, i32
  }
  func.func @transform_2(%arg0: i32) -> (i32, i32) {
    %c0_i32 = arith.constant 0 : i32
    %c0_i32_0 = arith.constant 0 : i32
    %c0_i32_1 = arith.constant 0 : i32
    return %c0_i32, %c0_i32_0 : i32, i32
  }
  func.func @transform_3(%arg0: i32) -> (i32, i32) {
    %c0_i32 = arith.constant 0 : i32
    %c0_i32_0 = arith.constant 0 : i32
    %c0_i32_1 = arith.constant 0 : i32
    return %c0_i32, %c0_i32_0 : i32, i32
  }
  func.func @transform_4(%arg0: i32) -> (i32, i32, i32) {
    %c0_i32 = arith.constant 0 : i32
    %c0_i32_0 = arith.constant 0 : i32
    %c0_i32_1 = arith.constant 0 : i32
    %c0_i32_2 = arith.constant 0 : i32
    return %c0_i32, %c0_i32_0, %c0_i32_1 : i32, i32, i32
  }
  func.func @transform_5(%arg0: i32) -> (i32, i32) {
    %c0_i32 = arith.constant 0 : i32
    %c0_i32_0 = arith.constant 0 : i32
    %c0_i32_1 = arith.constant 0 : i32
    return %c0_i32, %c0_i32_0 : i32, i32
  }
  func.func @transform_6(%arg0: i32) -> (i32, i32) {
    %c0_i32 = arith.constant 0 : i32
    %c0_i32_0 = arith.constant 0 : i32
    %c0_i32_1 = arith.constant 0 : i32
    return %c0_i32, %c0_i32_0 : i32, i32
  }
  func.func @transform_7(%arg0: i32) -> (i32, i32) {
    %c0_i32 = arith.constant 0 : i32
    %c0_i32_0 = arith.constant 0 : i32
    %c0_i32_1 = arith.constant 0 : i32
    return %c0_i32, %c0_i32_0 : i32, i32
  }
  func.func @transform_8(%arg0: i32) -> (i32, i32) {
    %c0_i32 = arith.constant 0 : i32
    %c0_i32_0 = arith.constant 0 : i32
    %c0_i32_1 = arith.constant 0 : i32
    return %c0_i32, %c0_i32_0 : i32, i32
  }
  func.func @transform_9(%arg0: i32) -> (i32, i32) {
    %c0_i32 = arith.constant 0 : i32
    %c0_i32_0 = arith.constant 0 : i32
    %c0_i32_1 = arith.constant 0 : i32
    return %c0_i32, %c0_i32_0 : i32, i32
  }
  func.func @transform_10(%arg0: i32) -> (i32, i32, i32, i32) {
    %c0_i32 = arith.constant 0 : i32
    %c0_i32_0 = arith.constant 0 : i32
    %c0_i32_1 = arith.constant 0 : i32
    %c0_i32_2 = arith.constant 0 : i32
    return %arg0, %c0_i32, %c0_i32_0, %c0_i32_1 : i32, i32, i32, i32
  }
}

</mosaic_0001>

<bundles_post_ra>
// kernel: tpu_custom_call.1
= control target key start
LH: loop header
LB: loop body
LE: loop exit
PB: predicated region body
PF: predicated region fallthrough
CT: control target
= control target key end

     0   :  { %15 = vsyncpa [#allocation5], 0  ;;  %s5403_s0 = inlined_call_operand.vmem [shape: f32[2,16,16,4], index: 0, kind: input, shape index: {}]   ;;  %s5404_s1 = inlined_call_operand.vmem [shape: f32[9,4,128], index: 1, kind: input, shape index: {}]   ;;  %s5405_s2 = inlined_call_operand.vmem [shape: f32[1,128], index: 2, kind: input, shape index: {}]   ;;  %s5406_s3 = inlined_call_operand.vmem [shape: f32[1,128], index: 3, kind: input, shape index: {}]   ;;  %s5407_s4 = inlined_call_operand.hbm [shape: f32[9,128,128], index: 4, kind: input, shape index: {}]   ;;  %s5408_s5 = inlined_call_operand.vmem [shape: f32[1,128], index: 5, kind: input, shape index: {}]   ;;  %s5409_s6 = inlined_call_operand.vmem [shape: f32[1,128], index: 6, kind: input, shape index: {}]   ;;  %s5410_s7 = inlined_call_operand.vmem [shape: f32[4,128], index: 7, kind: input, shape index: {}]   ;;  %s5411_s8 = inlined_call_operand.vmem [shape: f32[1,128], index: 8, kind: input, shape index: {}]   ;;  %s5412_s9 = inlined_call_operand.vmem [shape: f32[1,128], index: 9, kind: input, shape index: {}]   ;;  %s5413_s10 = inlined_call_operand.hbm [shape: f32[2,8,8,128], index: 10, kind: output, shape index: {}]  }
   0x1   :  { %16 = vsyncpa [#allocation6], 0 }
   0x2   :  { %18 = vsyncpa [#allocation6 + $0x1], 0  ;;  %s4693_s13 = smov 0   ;;  %s4695_s14 = smov 0  }
   0x3   :  { %s4697_s15 = smov 0   ;;  %s4699_s16 = smov 0  }
   0x4 LB: > { %s4714_s17 = sadd.s32 4294967295, %s4629_s16   ;;  %s3513_s18 = sadd.s32 4294967294, %s4629_s16   ;;  %s4629_s16 = sphi %s4699_s16, %s5455_s16   ;;  %s4625_s15 = sphi %s4697_s15, %s5454_s15   ;;  %s4621_s14 = sphi %s4695_s14, %s5453_s14   ;;  %s4617_s13 = sphi %s4693_s13, %s5452_s13  }
   0x5   : > { %s4718_s19 = sadd.s32 1, %s4629_s16   ;;  %s246_s20 = sadd.s32 1, %s4625_s15 }
   0x6   : > { %s243_s21 = ssub.s32 %s4629_s16, %s4718_s19  ;;  %p256_p0 = scmp.ne.s32.totalorder %s4625_s15, %s4621_s14 }
   0x7   : > { %p244_p1 = scmp.eq.s32.totalorder %s243_s21, 0  ;;  %p257_p2 = scmp.eq.s32.totalorder %s4714_s17, 1 }
   0x8   : > { %p262_p3 = scmp.ne.s32.totalorder %s4621_s14, %s4617_s13  ;;  %p263_p4 = scmp.eq.s32.totalorder %s3513_s18, 1 }
   0x9   : > { %s4729_s22 = scalar_select %p244_p1, %s4625_s15, %s246_s20  }
   0xa   : > { %p4731_p5 = por %p257_p2, %p256_p0  ;;  %p4735_p6 = por %p263_p4, %p262_p3 }
   0xb   : > { %p3514_p7 = scmp.ge.s32.totalorder %s4629_s16, 1  ;;  %p270_p8 = scmp.lt.s32.totalorder %s4629_s16, 3 }
   0xc   : > { %s5417_s24 = scalar_select %p4735_p6, 1, 0 }
   0xd   : > { %p4489_p9 = scmp.eq.s32.totalorder %s4714_s17, 0  ;;  %p4742_p10 = pnand %p3514_p7, %p270_p8 }
   0xe   : > { %s4631_s26 = smov [#allocation4]  }
   0xf   : > { %s291_s27 = sshll.u32 %s4631_s26, 4  ;;  %p4481_p11 = pneg %p4742_p10  ;;  %s292_s27 = int_to_ptr.vmem [resolvable:$true] %s291_s27 }
  0x10   : > { %s4550_s28 = scalar_lea.vmem %s292_s27, 18432  ;;  %p4558_p3 = scmp.lt.s32.totalorder %s292_s27, %s292_s27 }
  0x11   : > { %p4482_p12 = pnand %p4489_p9, %p4481_p11  ;;  %p4551_p0 = scmp.ne.s32.totalorder %s292_s27, %s4550_s28 }
  0x12   : > { %p4559_p4 = scmp.lt.s32.totalorder %s4550_s28, %s4550_s28 }
  0x13   : > { %p4541_p13 = pneg %p4482_p12 }
  0x14   : > { %p4560_p6 = por %p4559_p4, %p4558_p3 }
  0x15   : > { %p4553_p1 = pnand %p4551_p0, %p4541_p13 }
  0x17   : > { %p4554_p2 = pneg %p4553_p1 }
  0x19   : > { %p4561_p7 = pnand %p4560_p6, %p4554_p2 }
  0x1b   : > { %4564 = shalt.err (!%p4561_p7)
}
  0x1c   : > { %s4632_s29 = smov 128   ;;  %s4633_s30 = smov 8  }
  0x1d   : > { %4484 = dma.hbm_to_vmem [thread:$0]  (!%p4482_p12), %s5407_s4, 18432, %s292_s27, [#allocation5], %s4632_s29, %s4632_s29, %s4633_s30  }
  0x1e   : > { %330 = sbr.rel (%p4742_p10) target bundleno = 720 (0x2d0), region = 60 }
  0x23   : > { %4608 = dma.done.wait (%p4489_p9), [#allocation5], 18432  }
  0x24   : > { %4610 = vsyncadd (%p4489_p9), [#allocation5], 4294948864  ;;  %vm406_vm0 = vcmask 31744   ;;  %p368_p8 = scmp.lt.s32.totalorder %s4714_s17, 1  ;;  %v4634_v0 = vmov 0.0   ;;  %vm448_vm1 = vcmask 24576  }
  0x25   : > { %439 = vst.msk [vmem:[#allocation2] sm:$0xff] %vm406_vm0, %v4634_v0  ;;  %440 = vst.msk [vmem:[#allocation2 + $0x8] sm:$0xff] %vm406_vm0, %v4634_v0  ;;  %vm540_vm2 = vcmask 1043456   ;;  %v3522_v1 = vld [vmem:[%s5404_s1 + $0x4] sm:$0xf]  ;;  %s365_s27 = sand.u32 1, %s4621_s14  }
  0x26   : > { %441 = vst.msk [vmem:[#allocation2 + $0x10] sm:$0xff] %vm406_vm0, %v4634_v0  ;;  %1935 = vst [vmem:[#allocation3] sm:$0xff] %v4634_v0  ;;  %s369_s18 = scalar_select %p368_p8, %s4714_s17, 1  ;;  %v497_v2 = vld [vmem:[%s5404_s1] sm:$0xf]  ;;  %3939 = vmatprep.subr.msk.mxu0 %vm540_vm2, %v3522_v1 }
  0x27   : > { %1936 = vst [vmem:[#allocation3 + $0x8] sm:$0xff] %v4634_v0  ;;  %1937 = vst [vmem:[#allocation3 + $0x10] sm:$0xff] %v4634_v0  ;;  %v4837_v3 = vld [vmem:[%s5404_s1 + $0x8] sm:$0xf]  ;;  %3953 = vmatprep.subr.msk.mxu1 %vm540_vm2, %v497_v2  ;;  %3940 = vmatpush3.msk.msra.mxu0 %vm540_vm2, %v3522_v1  ;;  %v3551_v20 = vld [vmem:[%s5404_s1 + $0xc] sm:$0xf] }
  0x28   : > { %1939 = vst [vmem:[#allocation3 + $0xd8] sm:$0xff] %v4634_v0  ;;  %1940 = vst [vmem:[#allocation3 + $0xe0] sm:$0xff] %v4634_v0  ;;  %s3631_s20 = sshll.u32 %s369_s18, 8  ;;  %3954 = vmatpush3.msk.msra.mxu1 %vm540_vm2, %v497_v2  ;;  %3967 = vmatprep.subr.msk.mxu0 %vm540_vm2, %v4837_v3  ;;  %v3561_v33 = vld [vmem:[%s5404_s1 + $0x10] sm:$0xf]  ;;  %s3519_s28 = sshll.u32 %s365_s27, 6 }
  0x29   : > { %1941 = vst [vmem:[#allocation3 + $0xe8] sm:$0xff] %v4634_v0  ;;  %1942 = vst [vmem:[#allocation3 + $0x1f] sm:$0x1] %v4634_v0  ;;  %s4826_s26 = scalar_lea.vmem %s5403_s0, %s3631_s20  ;;  %3981 = vmatprep.subr.msk.mxu1 %vm540_vm2, %v3551_v20  ;;  %v3571_v50 = vld [vmem:[%s5404_s1 + $0x14] sm:$0xf]  ;;  %s5327_s29 = scalar_lea.vmem [#allocation7], %s3519_s28 }
  0x2a   : > { %1943 = vst [vmem:[#allocation3 + $0x37] sm:$0x1] %v4634_v0  ;;  %1944 = vst [vmem:[#allocation3 + $0x4f] sm:$0x1] %v4634_v0  ;;  %v375_v6 = vld [vmem:[%s4826_s26 + $0x10] sm:$0xff]  ;;  %v376_v7 = vld [vmem:[%s4826_s26 + $0x18] sm:$0xff] }
  0x2b   : > { %1945 = vst [vmem:[#allocation3 + $0x67] sm:$0x1] %v4634_v0  ;;  %1946 = vst [vmem:[#allocation3 + $0x7f] sm:$0x1] %v4634_v0  ;;  %v379_v8 = vld [vmem:[%s4826_s26 + $0x30] sm:$0xff]  ;;  %v380_v9 = vld [vmem:[%s4826_s26 + $0x38] sm:$0xff] }
  0x2c   : > { %1947 = vst [vmem:[#allocation3 + $0x97] sm:$0x1] %v4634_v0  ;;  %1948 = vst [vmem:[#allocation3 + $0xaf] sm:$0x1] %v4634_v0  ;;  %v383_v10 = vld [vmem:[%s4826_s26 + $0x50] sm:$0xff]  ;;  %v384_v11 = vld [vmem:[%s4826_s26 + $0x58] sm:$0xff] }
  0x2d   : > { %1949 = vst [vmem:[#allocation3 + $0xc7] sm:$0x1] %v4634_v0  ;;  %1950 = vst [vmem:[#allocation3 + $0x28] sm:$0x1] %v4634_v0  ;;  %v499_v4 = vld [vmem:[#allocation2 + $0x8] ss:$2 sm:$0xff] }
  0x2e   : > { %1951 = vst [vmem:[#allocation3 + $0x40] sm:$0x1] %v4634_v0  ;;  %1952 = vst [vmem:[#allocation3 + $0x58] sm:$0x1] %v4634_v0  ;;  %v482_v5 = vld [vmem:[#allocation2 + $0x7] ss:$2 sm:$0xff]  ;;  %3941 = vmatprep.mubr.msk.f32.mxu0 %vm406_vm0, %v499_v4 }
  0x2f   : > { %1953 = vst [vmem:[#allocation3 + $0x70] sm:$0x1] %v4634_v0  ;;  %1954 = vst [vmem:[#allocation3 + $0x88] sm:$0x1] %v4634_v0  ;;  %3955 = vmatprep.mubr.msk.f32.mxu1 %vm406_vm0, %v482_v5  ;;  %v387_v12 = vld [vmem:[%s4826_s26 + $0x70] sm:$0xff]  ;;  %v388_v13 = vld [vmem:[%s4826_s26 + $0x78] sm:$0xff] }
  0x30   : > { %1955 = vst [vmem:[#allocation3 + $0xa0] sm:$0x1] %v4634_v0  ;;  %1956 = vst [vmem:[#allocation3 + $0xb8] sm:$0x1] %v4634_v0  ;;  %v391_v14 = vld [vmem:[%s4826_s26 + $0x90] sm:$0xff]  ;;  %v392_v15 = vld [vmem:[%s4826_s26 + $0x98] sm:$0xff] }
  0x31   : > { %1957 = vst [vmem:[#allocation3 + $0xd0] sm:$0x1] %v4634_v0  ;;  %450 = vst.msk [vmem:[#allocation2 + $0x47] sm:$0x1] %vm448_vm1, %v4634_v0  ;;  %v395_v16 = vld [vmem:[%s4826_s26 + $0xb0] sm:$0xff]  ;;  %v396_v17 = vld [vmem:[%s4826_s26 + $0xb8] sm:$0xff] }
  0x32   : > { %449 = vst.msk [vmem:[#allocation2 + $0x27] sm:$0x1] %vm448_vm1, %v4634_v0  ;;  %451 = vst.msk [vmem:[#allocation2 + $0x67] sm:$0x1] %vm448_vm1, %v4634_v0  ;;  %v399_v18 = vld [vmem:[%s4826_s26 + $0xd0] sm:$0xff]  ;;  %v400_v19 = vld [vmem:[%s4826_s26 + $0xd8] sm:$0xff] }
  0x33   : > { %452 = vst.msk [vmem:[#allocation2 + $0x87] sm:$0x1] %vm448_vm1, %v4634_v0  ;;  %453 = vst.msk [vmem:[#allocation2 + $0xa7] sm:$0x1] %vm448_vm1, %v4634_v0  ;;  %v373_v21 = vld [vmem:[%s4826_s26] sm:$0xff]  ;;  %v374_v22 = vld [vmem:[%s4826_s26 + $0x8] sm:$0xff] }
  0x34   : > { %454 = vst.msk [vmem:[#allocation2 + $0xc7] sm:$0x1] %vm448_vm1, %v4634_v0  ;;  %455 = vst.msk [vmem:[#allocation2 + $0xe7] sm:$0x1] %vm448_vm1, %v4634_v0  ;;  %v377_v23 = vld [vmem:[%s4826_s26 + $0x20] sm:$0xff]  ;;  %v378_v24 = vld [vmem:[%s4826_s26 + $0x28] sm:$0xff] }
  0x35   : > { %456 = vst.msk [vmem:[#allocation2 + $0x107] sm:$0x1] %vm448_vm1, %v4634_v0  ;;  %457 = vst.msk [vmem:[#allocation2 + $0x127] sm:$0x1] %vm448_vm1, %v4634_v0  ;;  %v381_v25 = vld [vmem:[%s4826_s26 + $0x40] sm:$0xff]  ;;  %v382_v26 = vld [vmem:[%s4826_s26 + $0x48] sm:$0xff] }
  0x36   : > { %458 = vst.msk [vmem:[#allocation2 + $0x147] sm:$0x1] %vm448_vm1, %v4634_v0  ;;  %459 = vst.msk [vmem:[#allocation2 + $0x167] sm:$0x1] %vm448_vm1, %v4634_v0  ;;  %v385_v27 = vld [vmem:[%s4826_s26 + $0x60] sm:$0xff]  ;;  %v386_v28 = vld [vmem:[%s4826_s26 + $0x68] sm:$0xff] }
  0x37   : > { %460 = vst.msk [vmem:[#allocation2 + $0x187] sm:$0x1] %vm448_vm1, %v4634_v0  ;;  %461 = vst.msk [vmem:[#allocation2 + $0x1a7] sm:$0x1] %vm448_vm1, %v4634_v0  ;;  %v389_v42 = vld [vmem:[%s4826_s26 + $0x80] sm:$0xff]  ;;  %v390_v43 = vld [vmem:[%s4826_s26 + $0x88] sm:$0xff] }
  0x38   : > { %462 = vst.msk [vmem:[#allocation2 + $0x1c7] sm:$0x1] %vm448_vm1, %v4634_v0  ;;  %463 = vst.msk [vmem:[#allocation2 + $0x1e7] sm:$0x1] %vm448_vm1, %v4634_v0  ;;  %v393_v44 = vld [vmem:[%s4826_s26 + $0xa0] sm:$0xff]  ;;  %v394_v45 = vld [vmem:[%s4826_s26 + $0xa8] sm:$0xff] }
  0x39   : > { %464 = vst.msk [vmem:[#allocation2 + $0x207] sm:$0x1] %vm448_vm1, %v4634_v0  ;;  %v397_v48 = vld [vmem:[%s4826_s26 + $0xc0] sm:$0xff]  ;;  %v398_v49 = vld [vmem:[%s4826_s26 + $0xc8] sm:$0xff]  ;;  %v3581_v59 = vld [vmem:[%s5404_s1 + $0x18] sm:$0xf] }
  0x3a   : > { %409 = vst.msk [vmem:[#allocation2 + $0x48] sm:$0xff] %vm406_vm0, %v375_v6  ;;  %410 = vst.msk [vmem:[#allocation2 + $0x50] sm:$0xff] %vm406_vm0, %v376_v7  ;;  %v401_v51 = vld [vmem:[%s4826_s26 + $0xe0] sm:$0xff]  ;;  %v782_v52 = vld [vmem:[#allocation2 + $0x9] ss:$2 sm:$0xff]  ;;  %s3632_s30 = sshll.u32 %s4714_s17, 10 }
  0x3b   : > { %413 = vst.msk [vmem:[#allocation2 + $0x88] sm:$0xff] %vm406_vm0, %v379_v8  ;;  %414 = vst.msk [vmem:[#allocation2 + $0x90] sm:$0xff] %vm406_vm0, %v380_v9  ;;  %v402_v54 = vld [vmem:[%s4826_s26 + $0xe8] sm:$0xff]  ;;  %v3591_v60 = vld [vmem:[%s5404_s1 + $0x1c] sm:$0xf]  ;;  %s3391_s11 = sshll.u32 %s5327_s29, 4  ;;  %s5355_s18 = scalar_lea.hbm %s5413_s10, %s3632_s30  ;;  %s5357_s11 = int_to_ptr.vmem [resolvable:$true] %s3391_s11 }
  0x3c   : > { %417 = vst.msk [vmem:[#allocation2 + $0xc8] sm:$0xff] %vm406_vm0, %v383_v10  ;;  %418 = vst.msk [vmem:[#allocation2 + $0xd0] sm:$0xff] %vm406_vm0, %v384_v11  ;;  %v403_v6 = vld [vmem:[%s4826_s26 + $0xf0] sm:$0xff]  ;;  %v404_v7 = vld [vmem:[%s4826_s26 + $0xf8] sm:$0xff]  ;;  %s5363_s17 = scalar_lea.sflag [#allocation6], %s365_s27  ;;  %s4565_s20 = scalar_lea.vmem %s5357_s11, 1024 }
  0x3d   : > { %421 = vst.msk [vmem:[#allocation2 + $0x108] sm:$0xff] %vm406_vm0, %v387_v12  ;;  %422 = vst.msk [vmem:[#allocation2 + $0x110] sm:$0xff] %vm406_vm0, %v388_v13  ;;  %p4566_p6 = scmp.ne.s32.totalorder %s5357_s11, %s4565_s20  ;;  %s4635_s21 = smov [#allocation7]  }
  0x3e   : > { %425 = vst.msk [vmem:[#allocation2 + $0x148] sm:$0xff] %vm406_vm0, %v391_v14  ;;  %426 = vst.msk [vmem:[#allocation2 + $0x150] sm:$0xff] %vm406_vm0, %v392_v15  ;;  %s4569_s25 = sshll.u32 %s4635_s21, 4  ;;  %s4570_s25 = int_to_ptr.vmem [resolvable:$false] %s4569_s25 }
  0x3f   : > { %429 = vst.msk [vmem:[#allocation2 + $0x188] sm:$0xff] %vm406_vm0, %v395_v16  ;;  %430 = vst.msk [vmem:[#allocation2 + $0x190] sm:$0xff] %vm406_vm0, %v396_v17  ;;  %v3601_v16 = vld [vmem:[%s5404_s1 + $0x20] sm:$0xf]  ;;  %p4567_p9 = pnand %p4566_p6, %p4731_p5  ;;  %s4571_s28 = scalar_lea.vmem %s4570_s25, 2048 }
  0x40   : > { %433 = vst.msk [vmem:[#allocation2 + $0x1c8] sm:$0xff] %vm406_vm0, %v399_v18  ;;  %434 = vst.msk [vmem:[#allocation2 + $0x1d0] sm:$0xff] %vm406_vm0, %v400_v19  ;;  %p4572_p11 = scmp.lt.s32.totalorder %s5357_s11, %s4570_s25  ;;  %p4573_p12 = scmp.lt.s32.totalorder %s4571_s28, %s4565_s20 }
  0x41   : > { %407 = vst.msk [vmem:[#allocation2 + $0x28] sm:$0xff] %vm406_vm0, %v373_v21  ;;  %408 = vst.msk [vmem:[#allocation2 + $0x30] sm:$0xff] %vm406_vm0, %v374_v22  ;;  %v501_v29 = vld [vmem:[#allocation2 + $0x48] ss:$2 sm:$0xff]  ;;  %v484_v30 = vld [vmem:[#allocation2 + $0x47] ss:$2 sm:$0xff]  ;;  %p4568_p10 = pneg %p4567_p9 }
  0x42   : > { %411 = vst.msk [vmem:[#allocation2 + $0x68] sm:$0xff] %vm406_vm0, %v377_v23  ;;  %412 = vst.msk [vmem:[#allocation2 + $0x70] sm:$0xff] %vm406_vm0, %v378_v24  ;;  %v503_v31 = vld [vmem:[#allocation2 + $0x88] ss:$2 sm:$0xff]  ;;  %3942 = vmatmul.mubr.msk.f32.vlgmr.msra.gmra.mxu0 %vm406_vm0, %v501_v29  ;;  %3956 = vmatmul.mubr.msk.f32.vlgmr.msra.gmra.mxu1 %vm406_vm0, %v484_v30  ;;  %v486_v32 = vld [vmem:[#allocation2 + $0x87] ss:$2 sm:$0xff]  ;;  %p4574_p13 = por %p4573_p12, %p4572_p11 }
  0x43   : > { %415 = vst.msk [vmem:[#allocation2 + $0xa8] sm:$0xff] %vm406_vm0, %v381_v25  ;;  %416 = vst.msk [vmem:[#allocation2 + $0xb0] sm:$0xff] %vm406_vm0, %v382_v26  ;;  %3968 = vmatpush3.msk.msra.mxu0 %vm540_vm2, %v4837_v3  ;;  %3944 = vmatprep.mubr.msk.f32.mxu0 %vm406_vm0, %v503_v31  ;;  %v505_v34 = vld [vmem:[#allocation2 + $0xc8] ss:$2 sm:$0xff]  ;;  %v488_v35 = vld [vmem:[#allocation2 + $0xc7] ss:$2 sm:$0xff] }
  0x44   : > { %419 = vst.msk [vmem:[#allocation2 + $0xe8] sm:$0xff] %vm406_vm0, %v385_v27  ;;  %420 = vst.msk [vmem:[#allocation2 + $0xf0] sm:$0xff] %vm406_vm0, %v386_v28  ;;  %3958 = vmatprep.mubr.msk.f32.mxu1 %vm406_vm0, %v486_v32  ;;  %v507_v36 = vld [vmem:[#allocation2 + $0x108] ss:$2 sm:$0xff]  ;;  %v490_v37 = vld [vmem:[#allocation2 + $0x107] ss:$2 sm:$0xff]  ;;  %3982 = vmatpush3.msk.msra.mxu1 %vm540_vm2, %v3551_v20  ;;  %p4575_p0 = pnand %p4574_p13, %p4568_p10 }
  0x45   : > { %3995 = vmatprep.subr.msk.mxu0 %vm540_vm2, %v3561_v33  ;;  %v509_v38 = vld [vmem:[#allocation2 + $0x148] ss:$2 sm:$0xff]  ;;  %v492_v39 = vld [vmem:[#allocation2 + $0x147] ss:$2 sm:$0xff]  ;;  %423 = vst.msk [vmem:[#allocation2 + $0x128] sm:$0xff] %vm406_vm0, %v389_v42  ;;  %424 = vst.msk [vmem:[#allocation2 + $0x130] sm:$0xff] %vm406_vm0, %v390_v43  ;;  %4009 = vmatprep.subr.msk.mxu1 %vm540_vm2, %v3571_v50 }
  0x46   : > { %3945 = vmatmul.mubr.msk.f32.gmra.mxu0 %vm406_vm0, %v505_v34  ;;  %3959 = vmatmul.mubr.msk.f32.gmra.mxu1 %vm406_vm0, %v488_v35  ;;  %v511_v40 = vld [vmem:[#allocation2 + $0x188] ss:$2 sm:$0xff]  ;;  %v494_v41 = vld [vmem:[#allocation2 + $0x187] ss:$2 sm:$0xff]  ;;  %427 = vst.msk [vmem:[#allocation2 + $0x168] sm:$0xff] %vm406_vm0, %v393_v44  ;;  %428 = vst.msk [vmem:[#allocation2 + $0x170] sm:$0xff] %vm406_vm0, %v394_v45 }
  0x47   : > { %3947 = vmatprep.mubr.msk.f32.mxu0 %vm406_vm0, %v507_v36  ;;  %3961 = vmatprep.mubr.msk.f32.mxu1 %vm406_vm0, %v490_v37  ;;  %v513_v46 = vld [vmem:[#allocation2 + $0x1c8] ss:$2 sm:$0xff]  ;;  %v496_v47 = vld [vmem:[#allocation2 + $0x1c7] ss:$2 sm:$0xff]  ;;  %431 = vst.msk [vmem:[#allocation2 + $0x1a8] sm:$0xff] %vm406_vm0, %v397_v48  ;;  %432 = vst.msk [vmem:[#allocation2 + $0x1b0] sm:$0xff] %vm406_vm0, %v398_v49 }
  0x48   : > { %v940_v53 = vld [vmem:[#allocation2 + $0x27] ss:$2 sm:$0xff]  ;;  %435 = vst.msk [vmem:[#allocation2 + $0x1e8] sm:$0xff] %vm406_vm0, %v401_v51  ;;  %436 = vst.msk [vmem:[#allocation2 + $0x1f0] sm:$0xff] %vm406_vm0, %v402_v54  ;;  %v1098_v10 = vld [vmem:[#allocation2 + $0x28] ss:$2 sm:$0xff] }
  0x49   : > { %v784_v55 = vld [vmem:[#allocation2 + $0x49] ss:$2 sm:$0xff]  ;;  %437 = vst.msk [vmem:[#allocation2 + $0x208] sm:$0xff] %vm406_vm0, %v403_v6  ;;  %438 = vst.msk [vmem:[#allocation2 + $0x210] sm:$0xff] %vm406_vm0, %v404_v7  ;;  %v1100_v12 = vld [vmem:[#allocation2 + $0x68] ss:$2 sm:$0xff] }
  0x4a   : > { %3948 = vmatmul.mubr.msk.f32.gmra.mxu0 %vm406_vm0, %v509_v38  ;;  %3962 = vmatmul.mubr.msk.f32.gmra.mxu1 %vm406_vm0, %v492_v39  ;;  %v942_v56 = vld [vmem:[#allocation2 + $0x67] ss:$2 sm:$0xff]  ;;  %v1102_v14 = vld [vmem:[#allocation2 + $0xa8] ss:$2 sm:$0xff] }
  0x4b   : > { %3950 = vmatprep.mubr.msk.f32.mxu0 %vm406_vm0, %v511_v40  ;;  %3964 = vmatprep.mubr.msk.f32.mxu1 %vm406_vm0, %v494_v41  ;;  %v786_v57 = vld [vmem:[#allocation2 + $0x89] ss:$2 sm:$0xff]  ;;  %v1104_v17 = vld [vmem:[#allocation2 + $0xe8] ss:$2 sm:$0xff]  ;;  %v2005_v51 = vld [vmem:[#allocation4 + $0xf0] sm:$0xff] }
  0x4c   : > { %v944_v58 = vld [vmem:[#allocation2 + $0xa7] ss:$2 sm:$0xff]  ;;  %v1106_v19 = vld [vmem:[#allocation2 + $0x128] ss:$2 sm:$0xff] }
  0x4d   : > { %v788_v61 = vld [vmem:[#allocation2 + $0xc9] ss:$2 sm:$0xff]  ;;  %v1108_v21 = vld [vmem:[#allocation2 + $0x168] ss:$2 sm:$0xff] }
  0x4e   : > { %3951 = vmatmul.mubr.msk.f32.gmra.mxu0 %vm406_vm0, %v513_v46  ;;  %3965 = vmatmul.mubr.msk.f32.gmra.mxu1 %vm406_vm0, %v496_v47  ;;  %v946_v62 = vld [vmem:[#allocation2 + $0xe7] ss:$2 sm:$0xff]  ;;  %v1110_v23 = vld [vmem:[#allocation2 + $0x1a8] ss:$2 sm:$0xff] }
  0x4f   : > { %3969 = vmatprep.mubr.msk.f32.mxu0 %vm406_vm0, %v782_v52  ;;  %3983 = vmatprep.mubr.msk.f32.mxu1 %vm406_vm0, %v940_v53  ;;  %v790_v63 = vld [vmem:[#allocation2 + $0x109] ss:$2 sm:$0xff]  ;;  %v1112_v25 = vld [vmem:[#allocation2 + $0x1e8] ss:$2 sm:$0xff]  ;;  %v2004_v52 = vld [vmem:[#allocation4 + $0xe8] sm:$0xff] }
  0x50   : > { %v948_v1 = vld [vmem:[#allocation2 + $0x127] ss:$2 sm:$0xff]  ;;  %v1573_v28 = vld [vmem:[#allocation2 + $0x48] ss:$2 sm:$0xff] }
  0x51   : > { %v792_v2 = vld [vmem:[#allocation2 + $0x149] ss:$2 sm:$0xff]  ;;  %v1575_v30 = vld [vmem:[#allocation2 + $0x88] ss:$2 sm:$0xff] }
  0x52   : > { %3970 = vmatmul.mubr.msk.f32.vlgmr.msra.gmra.mxu0 %vm406_vm0, %v784_v55  ;;  %3984 = vmatmul.mubr.msk.f32.vlgmr.msra.gmra.mxu1 %vm406_vm0, %v942_v56  ;;  %v950_v3 = vld [vmem:[#allocation2 + $0x167] ss:$2 sm:$0xff]  ;;  %v1577_v32 = vld [vmem:[#allocation2 + $0xc8] ss:$2 sm:$0xff] }
  0x53   : > { %3996 = vmatpush3.msk.msra.mxu0 %vm540_vm2, %v3561_v33  ;;  %3972 = vmatprep.mubr.msk.f32.mxu0 %vm406_vm0, %v786_v57  ;;  %v794_v4 = vld [vmem:[#allocation2 + $0x189] ss:$2 sm:$0xff]  ;;  %v1579_v34 = vld [vmem:[#allocation2 + $0x108] ss:$2 sm:$0xff]  ;;  %v1980_v56 = vld [vmem:[#allocation4 + $0x70] sm:$0xff] }
  0x54   : > { %3986 = vmatprep.mubr.msk.f32.mxu1 %vm406_vm0, %v944_v58  ;;  %4010 = vmatpush3.msk.msra.mxu1 %vm540_vm2, %v3571_v50  ;;  %v952_v5 = vld [vmem:[#allocation2 + $0x1a7] ss:$2 sm:$0xff]  ;;  %v1581_v36 = vld [vmem:[#allocation2 + $0x148] ss:$2 sm:$0xff]  ;;  %v1979_v58 = vld [vmem:[#allocation4 + $0x68] sm:$0xff] }
  0x55   : > { %4023 = vmatprep.subr.msk.mxu0 %vm540_vm2, %v3581_v59  ;;  %4037 = vmatprep.subr.msk.mxu1 %vm540_vm2, %v3591_v60  ;;  %v796_v8 = vld [vmem:[#allocation2 + $0x1c9] ss:$2 sm:$0xff]  ;;  %v1583_v38 = vld [vmem:[#allocation2 + $0x188] ss:$2 sm:$0xff]  ;;  %v2001_v57 = vld [vmem:[#allocation4 + $0xd0] sm:$0xff] }
  0x56   : > { %3973 = vmatmul.mubr.msk.f32.gmra.mxu0 %vm406_vm0, %v788_v61  ;;  %3987 = vmatmul.mubr.msk.f32.gmra.mxu1 %vm406_vm0, %v946_v62  ;;  %v954_v9 = vld [vmem:[#allocation2 + $0x1e7] ss:$2 sm:$0xff]  ;;  %v1585_v40 = vld [vmem:[#allocation2 + $0x1c8] ss:$2 sm:$0xff] }
  0x57   : > { %3975 = vmatprep.mubr.msk.f32.mxu0 %vm406_vm0, %v790_v63  ;;  %3989 = vmatprep.mubr.msk.f32.mxu1 %vm406_vm0, %v948_v1  ;;  %v1256_v11 = vld [vmem:[#allocation2 + $0x29] ss:$2 sm:$0xff]  ;;  %v1587_v42 = vld [vmem:[#allocation2 + $0x208] ss:$2 sm:$0xff]  ;;  %v1976_v1 = vld [vmem:[#allocation4 + $0x50] sm:$0xff] }
  0x58   : > { %v1258_v13 = vld [vmem:[#allocation2 + $0x69] ss:$2 sm:$0xff] }
  0x59   : > { %v1260_v15 = vld [vmem:[#allocation2 + $0xa9] ss:$2 sm:$0xff] }
  0x5a   : > { %3976 = vmatmul.mubr.msk.f32.gmra.mxu0 %vm406_vm0, %v792_v2  ;;  %3990 = vmatmul.mubr.msk.f32.gmra.mxu1 %vm406_vm0, %v950_v3  ;;  %v1262_v18 = vld [vmem:[#allocation2 + $0xe9] ss:$2 sm:$0xff]  ;;  %v1997_v2 = vld [vmem:[#allocation4 + $0xb0] sm:$0xff]  ;;  %v1975_v3 = vld [vmem:[#allocation4 + $0x48] sm:$0xff] }
  0x5b   : > { %3978 = vmatprep.mubr.msk.f32.mxu0 %vm406_vm0, %v794_v4  ;;  %3992 = vmatprep.mubr.msk.f32.mxu1 %vm406_vm0, %v952_v5  ;;  %v1264_v20 = vld [vmem:[#allocation2 + $0x129] ss:$2 sm:$0xff]  ;;  %v1996_v4 = vld [vmem:[#allocation4 + $0xa8] sm:$0xff] }
  0x5c   : > { %v1266_v22 = vld [vmem:[#allocation2 + $0x169] ss:$2 sm:$0xff] }
  0x5d   : > { %v1268_v24 = vld [vmem:[#allocation2 + $0x1a9] ss:$2 sm:$0xff] }
  0x5e   : > { %3979 = vmatmul.mubr.msk.f32.gmra.mxu0 %vm406_vm0, %v796_v8  ;;  %3993 = vmatmul.mubr.msk.f32.gmra.mxu1 %vm406_vm0, %v954_v9  ;;  %v1270_v26 = vld [vmem:[#allocation2 + $0x1e9] ss:$2 sm:$0xff]  ;;  %v1972_v9 = vld [vmem:[#allocation4 + $0x30] sm:$0xff] }
  0x5f   : > { %3997 = vmatprep.mubr.msk.f32.mxu0 %vm406_vm0, %v1098_v10  ;;  %4011 = vmatprep.mubr.msk.f32.mxu1 %vm406_vm0, %v1256_v11  ;;  %v1415_v27 = vld [vmem:[#allocation2 + $0x47] ss:$2 sm:$0xff]  ;;  %v1971_v11 = vld [vmem:[#allocation4 + $0x28] sm:$0xff] }
  0x60   : > { %v1417_v29 = vld [vmem:[#allocation2 + $0x87] ss:$2 sm:$0xff] }
  0x61   : > { %v1419_v31 = vld [vmem:[#allocation2 + $0xc7] ss:$2 sm:$0xff] }
  0x62   : > { %3998 = vmatmul.mubr.msk.f32.vlgmr.msra.gmra.mxu0 %vm406_vm0, %v1100_v12  ;;  %4012 = vmatmul.mubr.msk.f32.vlgmr.msra.gmra.mxu1 %vm406_vm0, %v1258_v13  ;;  %v1421_v33 = vld [vmem:[#allocation2 + $0x107] ss:$2 sm:$0xff]  ;;  %v1992_v12 = vld [vmem:[#allocation4 + $0x88] sm:$0xff] }
  0x63   : > { %4024 = vmatpush3.msk.msra.mxu0 %vm540_vm2, %v3581_v59  ;;  %4000 = vmatprep.mubr.msk.f32.mxu0 %vm406_vm0, %v1102_v14  ;;  %v1423_v35 = vld [vmem:[#allocation2 + $0x147] ss:$2 sm:$0xff]  ;;  %v2000_v59 = vld [vmem:[#allocation4 + $0xc8] sm:$0xff] }
  0x64   : > { %4014 = vmatprep.mubr.msk.f32.mxu1 %vm406_vm0, %v1260_v15  ;;  %4038 = vmatpush3.msk.msra.mxu1 %vm540_vm2, %v3591_v60  ;;  %v1425_v37 = vld [vmem:[#allocation2 + $0x187] ss:$2 sm:$0xff] }
  0x65   : > { %4051 = vmatprep.subr.msk.mxu0 %vm540_vm2, %v3601_v16  ;;  %v1427_v39 = vld [vmem:[#allocation2 + $0x1c7] ss:$2 sm:$0xff] }
  0x66   : > { %4001 = vmatmul.mubr.msk.f32.gmra.mxu0 %vm406_vm0, %v1104_v17  ;;  %4015 = vmatmul.mubr.msk.f32.gmra.mxu1 %vm406_vm0, %v1262_v18  ;;  %v1429_v41 = vld [vmem:[#allocation2 + $0x207] ss:$2 sm:$0xff]  ;;  %v1967_v18 = vld [vmem:[#allocation4 + $0x8] sm:$0xff] }
  0x67   : > { %4003 = vmatprep.mubr.msk.f32.mxu0 %vm406_vm0, %v1106_v19  ;;  %4017 = vmatprep.mubr.msk.f32.mxu1 %vm406_vm0, %v1264_v20  ;;  %v1731_v43 = vld [vmem:[#allocation2 + $0x49] ss:$2 sm:$0xff]  ;;  %v1993_v10 = vld [vmem:[#allocation4 + $0x90] sm:$0xff] }
  0x68   : > { %v1733_v44 = vld [vmem:[#allocation2 + $0x89] ss:$2 sm:$0xff]  ;;  %v1968_v17 = vld [vmem:[#allocation4 + $0x10] sm:$0xff] }
  0x69   : > { %v1735_v45 = vld [vmem:[#allocation2 + $0xc9] ss:$2 sm:$0xff] }
  0x6a   : > { %4004 = vmatmul.mubr.msk.f32.gmra.mxu0 %vm406_vm0, %v1108_v21  ;;  %4018 = vmatmul.mubr.msk.f32.gmra.mxu1 %vm406_vm0, %v1266_v22  ;;  %v1737_v46 = vld [vmem:[#allocation2 + $0x109] ss:$2 sm:$0xff] }
  0x6b   : > { %4006 = vmatprep.mubr.msk.f32.mxu0 %vm406_vm0, %v1110_v23  ;;  %4020 = vmatprep.mubr.msk.f32.mxu1 %vm406_vm0, %v1268_v24  ;;  %v1739_v47 = vld [vmem:[#allocation2 + $0x149] ss:$2 sm:$0xff] }
  0x6c   : > { %v1741_v48 = vld [vmem:[#allocation2 + $0x189] ss:$2 sm:$0xff] }
  0x6d   : > { %v1743_v49 = vld [vmem:[#allocation2 + $0x1c9] ss:$2 sm:$0xff] }
  0x6e   : > { %4007 = vmatmul.mubr.msk.f32.gmra.mxu0 %vm406_vm0, %v1112_v25  ;;  %4021 = vmatmul.mubr.msk.f32.gmra.mxu1 %vm406_vm0, %v1270_v26  ;;  %v1745_v50 = vld [vmem:[#allocation2 + $0x209] ss:$2 sm:$0xff] }
  0x6f   : > { %4025 = vmatprep.mubr.msk.f32.mxu0 %vm406_vm0, %v1415_v27  ;;  %4039 = vmatprep.mubr.msk.f32.mxu1 %vm406_vm0, %v1573_v28  ;;  %v2003_v53 = vld [vmem:[#allocation4 + $0xe0] sm:$0xff]  ;;  %v1981_v54 = vld [vmem:[#allocation4 + $0x78] sm:$0xff] }
  0x70   : > { %v2002_v55 = vld [vmem:[#allocation4 + $0xd8] sm:$0xff]  ;;  %v1978_v60 = vld [vmem:[#allocation4 + $0x60] sm:$0xff] }
  0x71   : > { %v1999_v61 = vld [vmem:[#allocation4 + $0xc0] sm:$0xff]  ;;  %v1977_v62 = vld [vmem:[#allocation4 + $0x58] sm:$0xff] }
  0x72   : > { %4026 = vmatmul.mubr.msk.f32.vlgmr.msra.gmra.mxu0 %vm406_vm0, %v1417_v29  ;;  %4040 = vmatmul.mubr.msk.f32.vlgmr.msra.gmra.mxu1 %vm406_vm0, %v1575_v30  ;;  %v1998_v63 = vld [vmem:[#allocation4 + $0xb8] sm:$0xff]  ;;  %v1974_v5 = vld [vmem:[#allocation4 + $0x40] sm:$0xff] }
  0x73   : > { %4052 = vmatpush3.msk.msra.mxu0 %vm540_vm2, %v3601_v16  ;;  %4028 = vmatprep.mubr.msk.f32.mxu0 %vm406_vm0, %v1419_v31  ;;  %v1995_v6 = vld [vmem:[#allocation4 + $0xa0] sm:$0xff]  ;;  %v1973_v7 = vld [vmem:[#allocation4 + $0x38] sm:$0xff] }
  0x74   : > { %4042 = vmatprep.mubr.msk.f32.mxu1 %vm406_vm0, %v1577_v32  ;;  %4109 = vmatprep.subr.mxu0 %v1981_v54  ;;  %v1994_v8 = vld [vmem:[#allocation4 + $0x98] sm:$0xff]  ;;  %v1970_v13 = vld [vmem:[#allocation4 + $0x20] sm:$0xff] }
  0x75   : > { %v1991_v14 = vld [vmem:[#allocation4 + $0x80] sm:$0xff]  ;;  %v1969_v15 = vld [vmem:[#allocation4 + $0x18] sm:$0xff] }
  0x76   : > { %4029 = vmatmul.mubr.msk.f32.gmra.mxu0 %vm406_vm0, %v1421_v33  ;;  %4043 = vmatmul.mubr.msk.f32.gmra.mxu1 %vm406_vm0, %v1579_v34  ;;  %v5014_v16 = vld [vmem:[#allocation4 + $0x178] sm:$0xff]  ;;  %v1966_v19 = vld [vmem:[#allocation4] sm:$0xff] }
  0x77   : > { %4031 = vmatprep.mubr.msk.f32.mxu0 %vm406_vm0, %v1423_v35  ;;  %4045 = vmatprep.mubr.msk.f32.mxu1 %vm406_vm0, %v1581_v36  ;;  %5419 = vst [vmem:[#allocation10_spill] sm:$0xff] %v5014_v16  ;;  %v1958_v20 = vld [vmem:[#allocation3 + $0x7] sm:$0xff] }
  0x78   : > { %v5017_v21 = vld [vmem:[#allocation4 + $0x1f8] sm:$0xff] }
  0x79   : > { %5420 = vst [vmem:[#allocation11_spill] sm:$0xff] %v5017_v21 }
  0x7a   : > { %4032 = vmatmul.mubr.msk.f32.gmra.mxu0 %vm406_vm0, %v1425_v37  ;;  %4046 = vmatmul.mubr.msk.f32.gmra.mxu1 %vm406_vm0, %v1583_v38 }
  0x7b   : > { %4034 = vmatprep.mubr.msk.f32.mxu0 %vm406_vm0, %v1427_v39  ;;  %4048 = vmatprep.mubr.msk.f32.mxu1 %vm406_vm0, %v1585_v40 }
  0x7e   : > { %4035 = vmatmul.mubr.msk.f32.gmra.mxu0 %vm406_vm0, %v1429_v41  ;;  %4049 = vmatmul.mubr.msk.f32.gmra.mxu1 %vm406_vm0, %v1587_v42 }
  0x7f   : > { %4053 = vmatprep.mubr.msk.f32.mxu0 %vm406_vm0, %v1731_v43  ;;  %4097 = vmatprep.mubr.f32.mxu1 %v4634_v0  ;;  %v2006_v0 = vld [vmem:[#allocation4 + $0xf8] sm:$0xff] }
  0x80   : > { %4065 = vmatprep.subr.mxu1 %v2006_v0 }
  0x81   : > { %4066 = vmatpush3.msra.mxu1 %v2006_v0 }
  0x82   : > { %4054 = vmatmul.mubr.msk.f32.vlgmr.msra.gmra.mxu0 %vm406_vm0, %v1733_v44  ;;  %4067 = vmatprep.subr.mxu1 %v2005_v51 }
  0x83   : > { %4056 = vmatprep.mubr.msk.f32.mxu0 %vm406_vm0, %v1735_v45  ;;  %4068 = vmatpush3.msra.mxu1 %v2005_v51 }
  0x84   : > { %4069 = vmatprep.subr.mxu1 %v2004_v52  ;;  %4110 = vmatpush3.msra.mxu0 %v1981_v54 }
  0x85   : > { %4070 = vmatpush3.msra.mxu1 %v2004_v52  ;;  %4111 = vmatprep.subr.mxu0 %v1980_v56 }
  0x86   : > { %4057 = vmatmul.mubr.msk.f32.gmra.mxu0 %vm406_vm0, %v1737_v46  ;;  %4071 = vmatprep.subr.mxu1 %v2003_v53 }
  0x87   : > { %4059 = vmatprep.mubr.msk.f32.mxu0 %vm406_vm0, %v1739_v47  ;;  %4072 = vmatpush3.msra.mxu1 %v2003_v53 }
  0x88   : > { %4073 = vmatprep.subr.mxu1 %v2002_v55  ;;  %4112 = vmatpush3.msra.mxu0 %v1980_v56 }
  0x89   : > { %4074 = vmatpush3.msra.mxu1 %v2002_v55  ;;  %4113 = vmatprep.subr.mxu0 %v1979_v58 }
  0x8a   : > { %4060 = vmatmul.mubr.msk.f32.gmra.mxu0 %vm406_vm0, %v1741_v48  ;;  %4075 = vmatprep.subr.mxu1 %v2001_v57 }
  0x8b   : > { %4062 = vmatprep.mubr.msk.f32.mxu0 %vm406_vm0, %v1743_v49  ;;  %4076 = vmatpush3.msra.mxu1 %v2001_v57 }
  0x8c   : > { %4077 = vmatprep.subr.mxu1 %v2000_v59  ;;  %4114 = vmatpush3.msra.mxu0 %v1979_v58 }
  0x8d   : > { %4078 = vmatpush3.msra.mxu1 %v2000_v59  ;;  %4115 = vmatprep.subr.mxu0 %v1978_v60 }
  0x8e   : > { %4063 = vmatmul.mubr.msk.f32.gmra.mxu0 %vm406_vm0, %v1745_v50  ;;  %4079 = vmatprep.subr.mxu1 %v1999_v61 }
  0x8f   : > { %4116 = vmatpush3.msra.mxu0 %v1978_v60  ;;  %4080 = vmatpush3.msra.mxu1 %v1999_v61 }
  0x90   : > { %4117 = vmatprep.subr.mxu0 %v1977_v62  ;;  %4081 = vmatprep.subr.mxu1 %v1998_v63 }
  0x91   : > { %4118 = vmatpush3.msra.mxu0 %v1977_v62  ;;  %4082 = vmatpush3.msra.mxu1 %v1998_v63 }
  0x92   : > { %4119 = vmatprep.subr.mxu0 %v1976_v1  ;;  %4083 = vmatprep.subr.mxu1 %v1997_v2 }
  0x93   : > { %4120 = vmatpush3.msra.mxu0 %v1976_v1  ;;  %4084 = vmatpush3.msra.mxu1 %v1997_v2 }
  0x94   : > { %4121 = vmatprep.subr.mxu0 %v1975_v3  ;;  %4085 = vmatprep.subr.mxu1 %v1996_v4 }
  0x95   : > { %4122 = vmatpush3.msra.mxu0 %v1975_v3  ;;  %4086 = vmatpush3.msra.mxu1 %v1996_v4 }
  0x96   : > { %4123 = vmatprep.subr.mxu0 %v1974_v5  ;;  %4087 = vmatprep.subr.mxu1 %v1995_v6 }
  0x97   : > { %4124 = vmatpush3.msra.mxu0 %v1974_v5  ;;  %4088 = vmatpush3.msra.mxu1 %v1995_v6 }
  0x98   : > { %4125 = vmatprep.subr.mxu0 %v1973_v7  ;;  %4089 = vmatprep.subr.mxu1 %v1994_v8 }
  0x99   : > { %4126 = vmatpush3.msra.mxu0 %v1973_v7  ;;  %4090 = vmatpush3.msra.mxu1 %v1994_v8 }
  0x9a   : > { %4127 = vmatprep.subr.mxu0 %v1972_v9  ;;  %4091 = vmatprep.subr.mxu1 %v1993_v10 }
  0x9b   : > { %4128 = vmatpush3.msra.mxu0 %v1972_v9  ;;  %4092 = vmatpush3.msra.mxu1 %v1993_v10 }
  0x9c   : > { %4129 = vmatprep.subr.mxu0 %v1971_v11  ;;  %4093 = vmatprep.subr.mxu1 %v1992_v12 }
  0x9d   : > { %4130 = vmatpush3.msra.mxu0 %v1971_v11  ;;  %4094 = vmatpush3.msra.mxu1 %v1992_v12 }
  0x9e   : > { %4131 = vmatprep.subr.mxu0 %v1970_v13  ;;  %4095 = vmatprep.subr.mxu1 %v1991_v14 }
  0x9f   : > { %4132 = vmatpush3.msra.mxu0 %v1970_v13  ;;  %4096 = vmatpush3.msra.mxu1 %v1991_v14 }
  0xa0   : > { %4133 = vmatprep.subr.mxu0 %v1969_v15  ;;  %4153 = vmatprep.subr.mxu1 %v5014_v16 }
  0xa1   : > { %4134 = vmatpush3.msra.mxu0 %v1969_v15  ;;  %4141 = vmatprep.mubr.f32.mxu0 %v1958_v20 }
  0xa2   : > { %4135 = vmatprep.subr.mxu0 %v1968_v17 }
  0xa3   : > { %4136 = vmatpush3.msra.mxu0 %v1968_v17 }
  0xa4   : > { %4137 = vmatprep.subr.mxu0 %v1967_v18 }
  0xa5   : > { %4138 = vmatpush3.msra.mxu0 %v1967_v18 }
  0xa6   : > { %4139 = vmatprep.subr.mxu0 %v1966_v19 }
  0xa7   : > { %4140 = vmatpush3.msra.mxu0 %v1966_v19 }
  0xa8   : > { %4197 = vmatprep.subr.mxu0 %v5017_v21 }
 0x102   : > { %v3943_v22 = vpop.f32.mrf.mxu0  ;;  %v3957_v23 = vpop.f32.mrf.mxu1 }
 0x103   : > { %v748_v4 = vadd.f32 %v3957_v23, %v3943_v22 }
 0x104   : > { %v610_v24 = vpop.f32.mrf.mxu0  ;;  %v742_v25 = vpop.f32.mrf.mxu1 }
 0x105   : > { %v743_v7 = vadd.f32 %v742_v25, %v610_v24 }
 0x106   : > { %v3946_v26 = vpop.f32.mrf.mxu0  ;;  %v3960_v27 = vpop.f32.mrf.mxu1 }
 0x107   : > { %v758_v11 = vadd.f32 %v3960_v27, %v3946_v26 }
 0x108   : > { %v620_v28 = vpop.f32.mrf.mxu0  ;;  %v752_v29 = vpop.f32.mrf.mxu1 }
 0x109   : > { %v753_v15 = vadd.f32 %v752_v29, %v620_v28 }
 0x10a   : > { %v3949_v30 = vpop.f32.mrf.mxu0  ;;  %v3963_v31 = vpop.f32.mrf.mxu1 }
 0x10b   : > { %v768_v19 = vadd.f32 %v3963_v31, %v3949_v30 }
 0x10c   : > { %v630_v32 = vpop.f32.mrf.mxu0  ;;  %v762_v33 = vpop.f32.mrf.mxu1 }
 0x10d   : > { %v763_v23 = vadd.f32 %v762_v33, %v630_v32 }
 0x10e   : > { %v3952_v34 = vpop.f32.mrf.mxu0  ;;  %v3966_v35 = vpop.f32.mrf.mxu1 }
 0x110   : > { %v5020_v36 = vpop.f32.mrf.mxu0  ;;  %v5022_v37 = vpop.f32.mrf.mxu1 }
 0x111   : > { %v773_v29 = vadd.f32 %v5022_v37, %v5020_v36 }
 0x112   : > { %v3971_v38 = vpop.f32.mrf.mxu0  ;;  %v3985_v39 = vpop.f32.mrf.mxu1 }
 0x113   : > { %v932_v8 = vadd.f32 %v3971_v38, %v748_v4  ;;  %v778_v38 = vadd.f32 %v3966_v35, %v3952_v34 }
 0x114   : > { %v892_v40 = vpop.f32.mrf.mxu0  ;;  %v1050_v41 = vpop.f32.mrf.mxu1 }
 0x115   : > { %v931_v12 = vadd.f32 %v892_v40, %v743_v7  ;;  %v1090_v17 = vadd.f32 %v3985_v39, %v932_v8 }
 0x116   : > { %v3974_v42 = vpop.f32.mrf.mxu0  ;;  %v3988_v43 = vpop.f32.mrf.mxu1 }
 0x117   : > { %v934_v18 = vadd.f32 %v3974_v42, %v758_v11  ;;  %v1089_v21 = vadd.f32 %v1050_v41, %v931_v12 }
 0x118   : > { %v902_v44 = vpop.f32.mrf.mxu0  ;;  %v1060_v45 = vpop.f32.mrf.mxu1 }
 0x119   : > { %v933_v16 = vadd.f32 %v902_v44, %v753_v15  ;;  %v1092_v24 = vadd.f32 %v3988_v43, %v934_v18 }
 0x11a   : > { %v3977_v46 = vpop.f32.mrf.mxu0  ;;  %v3991_v47 = vpop.f32.mrf.mxu1 }
 0x11b   : > { %v1091_v27 = vadd.f32 %v1060_v45, %v933_v16 }
 0x11c   : > { %v912_v48 = vpop.f32.mrf.mxu0  ;;  %v1070_v49 = vpop.f32.mrf.mxu1 }
 0x11d   : > { %v935_v4 = vadd.f32 %v912_v48, %v763_v23 }
 0x11e   : > { %v3980_v50 = vpop.f32.mrf.mxu0  ;;  %v5024_v0 = vpop.f32.mrf.mxu1 }
 0x11f   : > { %v938_v31 = vadd.f32 %v3980_v50, %v778_v38  ;;  %v1093_v33 = vadd.f32 %v1070_v49, %v935_v4  ;;  %v5041_v49 = vld [vmem:[%s5405_s2] ss:$0 sm:$0xff] }
 0x120   : > { %v922_v51 = vpop.f32.mrf.mxu0  ;;  %v5026_v52 = vpop.f32.mrf.mxu1 }
 0x121   : > { %v937_v44 = vadd.f32 %v922_v51, %v773_v29  ;;  %v1096_v16 = vadd.f32 %v5024_v0, %v938_v31  ;;  %v2240_v31 = vld [vmem:[#allocation4 + $0x170] sm:$0xff] }
 0x122   : > { %v3999_v53 = vpop.f32.mrf.mxu0  ;;  %v4013_v54 = vpop.f32.mrf.mxu1 }
 0x123   : > { %v1095_v37 = vadd.f32 %v5026_v52, %v937_v44  ;;  %v5047_v52 = vld [vmem:[%s5406_s3] ss:$0 sm:$0xff] }
 0x124   : > { %v1208_v55 = vpop.f32.mrf.mxu0  ;;  %v1366_v56 = vpop.f32.mrf.mxu1 }
 0x125   : > { %v1247_v25 = vadd.f32 %v1208_v55, %v1089_v21 }
 0x126   : > { %v4002_v57 = vpop.f32.mrf.mxu0  ;;  %v4016_v58 = vpop.f32.mrf.mxu1 }
 0x127   : > { %v1250_v7 = vadd.f32 %v4002_v57, %v1092_v24  ;;  %v1405_v41 = vadd.f32 %v1366_v56, %v1247_v25 }
 0x128   : > { %v1218_v59 = vpop.f32.mrf.mxu0  ;;  %v1376_v60 = vpop.f32.mrf.mxu1 }
 0x129   : > { %v1249_v42 = vadd.f32 %v1218_v59, %v1091_v27  ;;  %v1408_v34 = vadd.f32 %v4016_v58, %v1250_v7 }
 0x12a   : > { %v4005_v61 = vpop.f32.mrf.mxu0  ;;  %v4019_v62 = vpop.f32.mrf.mxu1 }
 0x12c   : > { %v1228_v63 = vpop.f32.mrf.mxu0  ;;  %v5028_v1 = vpop.f32.mrf.mxu1 }
 0x12d   : > { %5421 = vst [vmem:[#allocation12_spill] sm:$0xff] %v5028_v1  ;;  %v936_v1 = vadd.f32 %v3977_v46, %v768_v19  ;;  %v1251_v45 = vadd.f32 %v1228_v63, %v1093_v33 }
 0x12e   : > { %v4008_v2 = vpop.f32.mrf.mxu0  ;;  %v5030_v3 = vpop.f32.mrf.mxu1 }
 0x12f   : > { %5422 = vst [vmem:[#allocation13_spill] sm:$0xff] %v5030_v3  ;;  %v1248_v3 = vadd.f32 %v3999_v53, %v1090_v17  ;;  %v1094_v30 = vadd.f32 %v3991_v47, %v936_v1  ;;  %v1407_v53 = vadd.f32 %v1376_v60, %v1249_v42  ;;  %v1254_v50 = vadd.f32 %v4008_v2, %v1096_v16 }
 0x130   : > { %v1238_v5 = vpop.f32.mrf.mxu0  ;;  %v5032_v6 = vpop.f32.mrf.mxu1 }
 0x131   : > { %5423 = vst [vmem:[#allocation14_spill] sm:$0xff] %v5032_v6  ;;  %v1406_v40 = vadd.f32 %v4013_v54, %v1248_v3  ;;  %v1252_v43 = vadd.f32 %v4005_v61, %v1094_v30  ;;  %v1253_v61 = vadd.f32 %v1238_v5, %v1095_v37 }
 0x132   : > { %v4027_v9 = vpop.f32.mrf.mxu0  ;;  %v4041_v10 = vpop.f32.mrf.mxu1 }
 0x133   : > { %v1565_v32 = vadd.f32 %v4027_v9, %v1406_v40  ;;  %v1410_v47 = vadd.f32 %v4019_v62, %v1252_v43  ;;  %v5427_v43 = vld [vmem:[#allocation10_spill] sm:$0xff] }
 0x134   : > { %v1525_v13 = vpop.f32.mrf.mxu0  ;;  %v1683_v14 = vpop.f32.mrf.mxu1  ;;  %v5424_v0 = vld [vmem:[#allocation12_spill] sm:$0xff] }
 0x135   : > { %v1564_v35 = vadd.f32 %v1525_v13, %v1405_v41  ;;  %v1723_v54 = vadd.f32 %v4041_v10, %v1565_v32  ;;  %v1409_v59 = vadd.f32 %v5424_v0, %v1251_v45 }
 0x136   : > { %v4030_v20 = vpop.f32.mrf.mxu0  ;;  %v4044_v22 = vpop.f32.mrf.mxu1  ;;  %v5425_v3 = vld [vmem:[#allocation13_spill] sm:$0xff] }
 0x137   : > { %v1567_v36 = vadd.f32 %v4030_v20, %v1408_v34  ;;  %v1722_v51 = vadd.f32 %v1683_v14, %v1564_v35  ;;  %v1412_v8 = vadd.f32 %v5425_v3, %v1254_v50 }
 0x138   : > { %v1535_v6 = vpop.f32.mrf.mxu0  ;;  %v1693_v28 = vpop.f32.mrf.mxu1  ;;  %v5426_v14 = vld [vmem:[#allocation14_spill] sm:$0xff] }
 0x139   : > { %v1566_v56 = vadd.f32 %v1535_v6, %v1407_v53  ;;  %v1725_v63 = vadd.f32 %v4044_v22, %v1567_v36  ;;  %v1411_v15 = vadd.f32 %v5426_v14, %v1253_v61  ;;  %v5428_v61 = vld [vmem:[#allocation11_spill] sm:$0xff]  ;;  %v2371_v14 = vld [vmem:[#allocation4 + $0x1b8] sm:$0xff] }
 0x13a   : > { %v4033_v26 = vpop.f32.mrf.mxu0  ;;  %v4047_v46 = vpop.f32.mrf.mxu1 }
 0x13b   : > { %v1569_v60 = vadd.f32 %v4033_v26, %v1410_v47  ;;  %v1724_v10 = vadd.f32 %v1693_v28, %v1566_v56  ;;  %v2237_v47 = vld [vmem:[#allocation4 + $0x158] sm:$0xff] }
 0x13c   : > { %v1545_v39 = vpop.f32.mrf.mxu0  ;;  %v1703_v57 = vpop.f32.mrf.mxu1 }
 0x13d   : > { %v1568_v9 = vadd.f32 %v1545_v39, %v1409_v59  ;;  %v1727_v17 = vadd.f32 %v4047_v46, %v1569_v60  ;;  %v2377_v60 = vld [vmem:[#allocation4 + $0x1e8] sm:$0xff] }
 0x13e   : > { %v4036_v21 = vpop.f32.mrf.mxu0  ;;  %v4050_v11 = vpop.f32.mrf.mxu1 }
 0x13f   : > { %v1571_v18 = vadd.f32 %v4036_v21, %v1412_v8  ;;  %v1726_v25 = vadd.f32 %v1703_v57, %v1568_v9  ;;  %v2239_v21 = vld [vmem:[#allocation4 + $0x168] sm:$0xff]  ;;  %v2378_v57 = vld [vmem:[#allocation4 + $0x1f0] sm:$0xff] }
 0x140   : > { %v1555_v48 = vpop.f32.mrf.mxu0  ;;  %v1713_v26 = vpop.f32.mrf.mxu1  ;;  %v2374_v8 = vld [vmem:[#allocation4 + $0x1d0] sm:$0xff] }
 0x141   : > { %v1570_v38 = vadd.f32 %v1555_v48, %v1411_v15  ;;  %v1729_v29 = vadd.f32 %v4050_v11, %v1571_v18  ;;  %v2238_v48 = vld [vmem:[#allocation4 + $0x160] sm:$0xff]  ;;  %v2232_v15 = vld [vmem:[#allocation4 + $0x130] sm:$0xff]  ;;  %v2231_v18 = vld [vmem:[#allocation4 + $0x128] sm:$0xff] }
 0x142   : > { %v4055_v55 = vpop.f32.mrf.mxu0 }
 0x143   : > { %v1881_v58 = vadd.f32 %v4055_v55, %v1723_v54  ;;  %v1728_v33 = vadd.f32 %v1713_v26, %v1570_v38  ;;  %v2228_v38 = vld [vmem:[#allocation4 + $0x110] sm:$0xff]  ;;  %v2227_v26 = vld [vmem:[#allocation4 + $0x108] sm:$0xff] }
 0x144   : > { %v1841_v62 = vpop.f32.mrf.mxu0 }
 0x145   : > { %v1896_v1 = vmul.f32 %v5041_v49, %v1881_v58  ;;  %v1880_v2 = vadd.f32 %v1841_v62, %v1722_v51 }
 0x146   : > { %v4058_v6 = vpop.f32.mrf.mxu0 }
 0x147   : > { %v1911_v12 = vadd.f32 %v5047_v52, %v1896_v1  ;;  %v1895_v5 = vmul.f32 %v5041_v49, %v1880_v2  ;;  %v1883_v13 = vadd.f32 %v4058_v6, %v1725_v63  ;;  %v2236_v1 = vld [vmem:[#allocation4 + $0x150] sm:$0xff]  ;;  %v2375_v2 = vld [vmem:[#allocation4 + $0x1d8] sm:$0xff]  ;;  %v2235_v6 = vld [vmem:[#allocation4 + $0x148] sm:$0xff] }
 0x148   : > { %v1851_v19 = vpop.f32.mrf.mxu0 }
 0x149   : > { %v5054_v20 = vmax.f32 %v1911_v12, 0.0  ;;  %v1910_v22 = vadd.f32 %v5047_v52, %v1895_v5  ;;  %v1898_v23 = vmul.f32 %v5041_v49, %v1883_v13  ;;  %v1882_v24 = vadd.f32 %v1851_v19, %v1724_v10  ;;  %v2373_v10 = vld [vmem:[#allocation4 + $0x1c8] sm:$0xff]  ;;  %v2234_v12 = vld [vmem:[#allocation4 + $0x140] sm:$0xff]  ;;  %v2233_v13 = vld [vmem:[#allocation4 + $0x138] sm:$0xff] }
 0x14a   : > { %v4061_v4 = vpop.f32.mrf.mxu0  ;;  %v2372_v5 = vld [vmem:[#allocation4 + $0x1c0] sm:$0xff]  ;;  %v2369_v19 = vld [vmem:[#allocation4 + $0x1a8] sm:$0xff] }
 0x14b   : > { %1928 = vst [vmem:[#allocation3 + $0x38] sm:$0xff] %v5054_v20  ;;  %v5059_v27 = vmax.f32 %v1910_v22, 0.0  ;;  %v1913_v40 = vadd.f32 %v5047_v52, %v1898_v23  ;;  %v1897_v7 = vmul.f32 %v5041_v49, %v1882_v24  ;;  %v1885_v28 = vadd.f32 %v4061_v4, %v1727_v17  ;;  %v2370_v17 = vld [vmem:[#allocation4 + $0x1b0] sm:$0xff]  ;;  %v2230_v22 = vld [vmem:[#allocation4 + $0x120] sm:$0xff]  ;;  %v2229_v24 = vld [vmem:[#allocation4 + $0x118] sm:$0xff] }
 0x14c   : > { %v1861_v30 = vpop.f32.mrf.mxu0  ;;  %v2368_v23 = vld [vmem:[#allocation4 + $0x1a0] sm:$0xff]  ;;  %v2366_v4 = vld [vmem:[#allocation4 + $0x190] sm:$0xff] }
 0x14d   : > { %1927 = vst [vmem:[#allocation3 + $0x20] sm:$0xff] %v5059_v27  ;;  %v5064_v39 = vmax.f32 %v1913_v40, 0.0  ;;  %v1912_v41 = vadd.f32 %v5047_v52, %v1897_v7  ;;  %v1900_v42 = vmul.f32 %v5041_v49, %v1885_v28  ;;  %v1884_v32 = vadd.f32 %v1861_v30, %v1726_v25  ;;  %4098 = vmatmul.mubr.f32.vlgmr.msra.gmra.mxu1 %v5059_v27  ;;  %v2367_v25 = vld [vmem:[#allocation4 + $0x198] sm:$0xff]  ;;  %v2365_v40 = vld [vmem:[#allocation4 + $0x188] sm:$0xff]  ;;  %v2226_v7 = vld [vmem:[#allocation4 + $0x100] sm:$0xff] }
 0x14e   : > { %v4064_v44 = vpop.f32.mrf.mxu0  ;;  %4154 = vmatpush3.msra.mxu1 %v5427_v43  ;;  %4100 = vmatprep.mubr.f32.mxu1 %v5054_v20  ;;  %v2364_v28 = vld [vmem:[#allocation4 + $0x180] sm:$0xff]  ;;  %v2517_v30 = vld [vmem:[#allocation4 + $0x278] sm:$0xff] }
 0x14f   : > { %1930 = vst [vmem:[#allocation3 + $0x68] sm:$0xff] %v5064_v39  ;;  %v5072_v34 = vmax.f32 %v1912_v41, 0.0  ;;  %v1915_v35 = vadd.f32 %v5047_v52, %v1900_v42  ;;  %v1899_v46 = vmul.f32 %v5041_v49, %v1884_v32  ;;  %v1887_v16 = vadd.f32 %v4064_v44, %v1729_v29  ;;  %4155 = vmatprep.subr.mxu1 %v2240_v31  ;;  %v2217_v29 = vld [vmem:[#allocation3 + $0x9] sm:$0xff]  ;;  %v2516_v32 = vld [vmem:[#allocation4 + $0x270] sm:$0xff]  ;;  %v2515_v44 = vld [vmem:[#allocation4 + $0x268] sm:$0xff] }
 0x150   : > { %v1871_v45 = vpop.f32.mrf.mxu0  ;;  %4156 = vmatpush3.msra.mxu1 %v2240_v31  ;;  %v2655_v41 = vld [vmem:[#allocation4 + $0x2f8] sm:$0xff] }
 0x151   : > { %1929 = vst [vmem:[#allocation3 + $0x50] sm:$0xff] %v5072_v34  ;;  %v5077_v53 = vmax.f32 %v1915_v35, 0.0  ;;  %v1914_v54 = vadd.f32 %v5047_v52, %v1899_v46  ;;  %v1902_v36 = vmul.f32 %v5041_v49, %v1887_v16  ;;  %v1886_v37 = vadd.f32 %v1871_v45, %v1728_v33  ;;  %4157 = vmatprep.subr.mxu1 %v2239_v21  ;;  %v2654_v33 = vld [vmem:[#allocation4 + $0x2f0] sm:$0xff]  ;;  %v2514_v46 = vld [vmem:[#allocation4 + $0x260] sm:$0xff]  ;;  %v2513_v45 = vld [vmem:[#allocation4 + $0x258] sm:$0xff] }
 0x152   : > { %4101 = vmatmul.mubr.f32.gmra.mxu1 %v5072_v34  ;;  %v5092_v59 = vld [vmem:[#allocation3 + $0x37] sm:$0xff] }
 0x153   : > { %4158 = vmatpush3.msra.mxu1 %v2239_v21  ;;  %4103 = vmatprep.mubr.f32.mxu1 %v5064_v39  ;;  %1932 = vst [vmem:[#allocation3 + $0x98] sm:$0xff] %v5077_v53  ;;  %v5084_v50 = vmax.f32 %v1914_v54, 0.0  ;;  %v1917_v55 = vadd.f32 %v5047_v52, %v1902_v36  ;;  %v1901_v51 = vmul.f32 %v5041_v49, %v1886_v37  ;;  %v5122_v42 = vld [vmem:[#allocation3 + $0x39] sm:$0xff]  ;;  %v2652_v16 = vld [vmem:[#allocation4 + $0x2e0] sm:$0xff]  ;;  %v2651_v54 = vld [vmem:[#allocation4 + $0x2d8] sm:$0xff] }
 0x154   : > { %4159 = vmatprep.subr.mxu1 %v2238_v48  ;;  %v1959_v56 = vld [vmem:[#allocation3 + $0x1f] sm:$0xff] }
 0x155   : > { %4160 = vmatpush3.msra.mxu1 %v2238_v48  ;;  %1931 = vst [vmem:[#allocation3 + $0x80] sm:$0xff] %v5084_v50  ;;  %v5089_v58 = vmax.f32 %v1917_v55, 0.0  ;;  %v1916_v0 = vadd.f32 %v5047_v52, %v1901_v51  ;;  %4142 = vmatmul.mubr.f32.vlgmr.msra.gmra.mxu0 %v1959_v56  ;;  %v2376_v52 = vld [vmem:[#allocation4 + $0x1e0] sm:$0xff]  ;;  %v5118_v31 = vld [vmem:[#allocation3 + $0x21] sm:$0xff]  ;;  %v2653_v21 = vld [vmem:[#allocation4 + $0x2e8] sm:$0xff] }
 0x156   : > { %4161 = vmatprep.subr.mxu1 %v2237_v47  ;;  %4198 = vmatpush3.msra.mxu0 %v5428_v61  ;;  %v5104_v63 = vld [vmem:[#allocation3 + $0x67] sm:$0xff]  ;;  %v2511_v55 = vld [vmem:[#allocation4 + $0x248] sm:$0xff]  ;;  %v2648_v61 = vld [vmem:[#allocation4 + $0x2c0] sm:$0xff] }
 0x157   : > { %4144 = vmatprep.mubr.f32.mxu0 %v5092_v59  ;;  %1934 = vst [vmem:[#allocation3 + $0xc8] sm:$0xff] %v5089_v58  ;;  %v5097_v49 = vmax.f32 %v1916_v0, 0.0  ;;  %4199 = vmatprep.subr.mxu0 %v2378_v57  ;;  %v5130_v35 = vld [vmem:[#allocation3 + $0x69] sm:$0xff]  ;;  %v2512_v37 = vld [vmem:[#allocation4 + $0x250] sm:$0xff] }
 0x158   : > { %4104 = vmatmul.mubr.f32.gmra.mxu1 %v5084_v50  ;;  %4200 = vmatpush3.msra.mxu0 %v2378_v57  ;;  %v5100_v62 = vld [vmem:[#allocation3 + $0x4f] sm:$0xff] }
 0x159   : > { %4162 = vmatpush3.msra.mxu1 %v2237_v47  ;;  %1933 = vst [vmem:[#allocation3 + $0xb0] sm:$0xff] %v5097_v49  ;;  %4201 = vmatprep.subr.mxu0 %v2377_v60  ;;  %v5126_v43 = vld [vmem:[#allocation3 + $0x51] sm:$0xff]  ;;  %v2650_v47 = vld [vmem:[#allocation4 + $0x2d0] sm:$0xff] }
 0x15a   : > { %4145 = vmatmul.mubr.f32.gmra.mxu0 %v5100_v62  ;;  %4106 = vmatprep.mubr.f32.mxu1 %v5077_v53  ;;  %v5111_v9 = vld [vmem:[#allocation3 + $0x97] sm:$0xff] }
 0x15b   : > { %4202 = vmatpush3.msra.mxu0 %v2377_v60  ;;  %4147 = vmatprep.mubr.f32.mxu0 %v5104_v63  ;;  %v5138_v36 = vld [vmem:[#allocation3 + $0x99] sm:$0xff]  ;;  %v2510_v0 = vld [vmem:[#allocation4 + $0x240] sm:$0xff]  ;;  %v2509_v60 = vld [vmem:[#allocation4 + $0x238] sm:$0xff] }
 0x15c   : > { %4203 = vmatprep.subr.mxu0 %v2376_v52  ;;  %v5108_v3 = vld [vmem:[#allocation3 + $0x7f] sm:$0xff]  ;;  %4163 = vmatprep.subr.mxu1 %v2236_v1 }
 0x15d   : > { %4204 = vmatpush3.msra.mxu0 %v2376_v52  ;;  %4164 = vmatpush3.msra.mxu1 %v2236_v1  ;;  %v5134_v48 = vld [vmem:[#allocation3 + $0x81] sm:$0xff] }
 0x15e   : > { %4205 = vmatprep.subr.mxu0 %v2375_v2  ;;  %4148 = vmatmul.mubr.f32.gmra.mxu0 %v5108_v3  ;;  %v5145_v57 = vld [vmem:[#allocation3 + $0xc7] sm:$0xff] }
 0x15f   : > { %4206 = vmatpush3.msra.mxu0 %v2375_v2  ;;  %4150 = vmatprep.mubr.f32.mxu0 %v5111_v9  ;;  %v2647_v52 = vld [vmem:[#allocation4 + $0x2b8] sm:$0xff]  ;;  %v2508_v1 = vld [vmem:[#allocation4 + $0x230] sm:$0xff] }
 0x160   : > { %4207 = vmatprep.subr.mxu0 %v2374_v8  ;;  %4165 = vmatprep.subr.mxu1 %v2235_v6  ;;  %v5114_v11 = vld [vmem:[#allocation3 + $0xaf] sm:$0xff]  ;;  %v2646_v2 = vld [vmem:[#allocation4 + $0x2b0] sm:$0xff] }
 0x161   : > { %4208 = vmatpush3.msra.mxu0 %v2374_v8  ;;  %4107 = vmatmul.mubr.f32.gmra.mxu1 %v5097_v49  ;;  %v5142_v51 = vld [vmem:[#allocation3 + $0xb1] sm:$0xff] }
 0x162   : > { %4209 = vmatprep.subr.mxu0 %v2373_v10  ;;  %4151 = vmatmul.mubr.f32.gmra.mxu0 %v5114_v11  ;;  %v2507_v8 = vld [vmem:[#allocation4 + $0x228] sm:$0xff] }
 0x163   : > { %4166 = vmatpush3.msra.mxu1 %v2235_v6  ;;  %4210 = vmatpush3.msra.mxu0 %v2373_v10  ;;  %v2645_v6 = vld [vmem:[#allocation4 + $0x2a8] sm:$0xff]  ;;  %v2644_v10 = vld [vmem:[#allocation4 + $0x2a0] sm:$0xff] }
 0x164   : > { %4167 = vmatprep.subr.mxu1 %v2234_v12  ;;  %4211 = vmatprep.subr.mxu0 %v2372_v5 }
 0x165   : > { %4229 = vmatprep.mubr.f32.mxu0 %v1959_v56  ;;  %4168 = vmatpush3.msra.mxu1 %v2234_v12  ;;  %v2649_v56 = vld [vmem:[#allocation4 + $0x2c8] sm:$0xff]  ;;  %v2505_v12 = vld [vmem:[#allocation4 + $0x218] sm:$0xff] }
 0x166   : > { %4212 = vmatpush3.msra.mxu0 %v2372_v5  ;;  %4169 = vmatprep.subr.mxu1 %v2233_v13  ;;  %v2643_v5 = vld [vmem:[#allocation4 + $0x298] sm:$0xff] }
 0x167   : > { %4213 = vmatprep.subr.mxu0 %v2371_v14  ;;  %4170 = vmatpush3.msra.mxu1 %v2233_v13  ;;  %v2504_v13 = vld [vmem:[#allocation4 + $0x210] sm:$0xff] }
 0x168   : > { %4214 = vmatpush3.msra.mxu0 %v2371_v14  ;;  %4171 = vmatprep.subr.mxu1 %v2232_v15  ;;  %v2642_v14 = vld [vmem:[#allocation4 + $0x290] sm:$0xff] }
 0x169   : > { %4215 = vmatprep.subr.mxu0 %v2370_v17  ;;  %4172 = vmatpush3.msra.mxu1 %v2232_v15  ;;  %v2503_v15 = vld [vmem:[#allocation4 + $0x208] sm:$0xff] }
 0x16a   : > { %4216 = vmatpush3.msra.mxu0 %v2370_v17  ;;  %4173 = vmatprep.subr.mxu1 %v2231_v18  ;;  %v2641_v17 = vld [vmem:[#allocation4 + $0x288] sm:$0xff] }
 0x16b   : > { %4217 = vmatprep.subr.mxu0 %v2369_v19  ;;  %4174 = vmatpush3.msra.mxu1 %v2231_v18  ;;  %v2502_v18 = vld [vmem:[#allocation4 + $0x200] sm:$0xff] }
 0x16c   : > { %4218 = vmatpush3.msra.mxu0 %v2369_v19  ;;  %4175 = vmatprep.subr.mxu1 %v2230_v22  ;;  %v2640_v19 = vld [vmem:[#allocation4 + $0x280] sm:$0xff] }
 0x16d   : > { %4219 = vmatprep.subr.mxu0 %v2368_v23  ;;  %4176 = vmatpush3.msra.mxu1 %v2230_v22  ;;  %v2794_v22 = vld [vmem:[#allocation4 + $0x378] sm:$0xff] }
 0x16e   : > { %4220 = vmatpush3.msra.mxu0 %v2368_v23  ;;  %4177 = vmatprep.subr.mxu1 %v2229_v24  ;;  %v2932_v23 = vld [vmem:[#allocation4 + $0x3f8] sm:$0xff] }
 0x16f   : > { %4221 = vmatprep.subr.mxu0 %v2367_v25  ;;  %4178 = vmatpush3.msra.mxu1 %v2229_v24  ;;  %v2793_v24 = vld [vmem:[#allocation4 + $0x370] sm:$0xff] }
 0x170   : > { %4222 = vmatpush3.msra.mxu0 %v2367_v25  ;;  %4179 = vmatprep.subr.mxu1 %v2228_v38  ;;  %v2931_v25 = vld [vmem:[#allocation4 + $0x3f0] sm:$0xff] }
 0x171   : > { %4223 = vmatprep.subr.mxu0 %v2366_v4  ;;  %4180 = vmatpush3.msra.mxu1 %v2228_v38  ;;  %v2792_v38 = vld [vmem:[#allocation4 + $0x368] sm:$0xff] }
 0x172   : > { %4224 = vmatpush3.msra.mxu0 %v2366_v4  ;;  %4181 = vmatprep.subr.mxu1 %v2227_v26  ;;  %v2930_v4 = vld [vmem:[#allocation4 + $0x3e8] sm:$0xff] }
 0x173   : > { %4225 = vmatprep.subr.mxu0 %v2365_v40  ;;  %4182 = vmatpush3.msra.mxu1 %v2227_v26  ;;  %v2791_v26 = vld [vmem:[#allocation4 + $0x360] sm:$0xff] }
 0x174   : > { %4226 = vmatpush3.msra.mxu0 %v2365_v40  ;;  %4183 = vmatprep.subr.mxu1 %v2226_v7  ;;  %v2929_v40 = vld [vmem:[#allocation4 + $0x3e0] sm:$0xff] }
 0x175   : > { %4227 = vmatprep.subr.mxu0 %v2364_v28  ;;  %4184 = vmatpush3.msra.mxu1 %v2226_v7  ;;  %v2790_v7 = vld [vmem:[#allocation4 + $0x358] sm:$0xff] }
 0x176   : > { %4185 = vmatprep.mubr.f32.mxu1 %v2217_v29  ;;  %4228 = vmatpush3.msra.mxu0 %v2364_v28  ;;  %v2928_v28 = vld [vmem:[#allocation4 + $0x3d8] sm:$0xff]  ;;  %v2789_v29 = vld [vmem:[#allocation4 + $0x350] sm:$0xff] }
 0x177   : > { %4186 = vmatmul.mubr.f32.vlgmr.msra.gmra.mxu1 %v5118_v31  ;;  %4230 = vmatmul.mubr.f32.vlgmr.msra.gmra.mxu0 %v5092_v59 }
 0x178   : > { %4241 = vmatprep.subr.mxu1 %v2517_v30  ;;  %4285 = vmatprep.subr.mxu0 %v2655_v41 }
 0x179   : > { %4188 = vmatprep.mubr.f32.mxu1 %v5122_v42  ;;  %4232 = vmatprep.mubr.f32.mxu0 %v5100_v62 }
 0x17a   : > { %4242 = vmatpush3.msra.mxu1 %v2517_v30  ;;  %4286 = vmatpush3.msra.mxu0 %v2655_v41  ;;  %v2927_v30 = vld [vmem:[#allocation4 + $0x3d0] sm:$0xff]  ;;  %v2926_v41 = vld [vmem:[#allocation4 + $0x3c8] sm:$0xff] }
 0x17b   : > { %4243 = vmatprep.subr.mxu1 %v2516_v32  ;;  %4287 = vmatprep.subr.mxu0 %v2654_v33 }
 0x17c   : > { %4244 = vmatpush3.msra.mxu1 %v2516_v32  ;;  %4288 = vmatpush3.msra.mxu0 %v2654_v33  ;;  %v5163_v32 = vld [vmem:[#allocation3 + $0xc9] sm:$0xff] }
 0x17d   : > { %4189 = vmatmul.mubr.f32.gmra.mxu1 %v5126_v43  ;;  %4233 = vmatmul.mubr.f32.gmra.mxu0 %v5104_v63  ;;  %v2787_v33 = vld [vmem:[#allocation4 + $0x340] sm:$0xff] }
 0x17e   : > { %4245 = vmatprep.subr.mxu1 %v2515_v44  ;;  %4289 = vmatprep.subr.mxu0 %v2653_v21 }
 0x17f   : > { %4191 = vmatprep.mubr.f32.mxu1 %v5130_v35  ;;  %4235 = vmatprep.mubr.f32.mxu0 %v5108_v3 }
 0x180   : > { %4246 = vmatpush3.msra.mxu1 %v2515_v44  ;;  %4290 = vmatpush3.msra.mxu0 %v2653_v21  ;;  %v2925_v44 = vld [vmem:[#allocation4 + $0x3c0] sm:$0xff]  ;;  %v2786_v21 = vld [vmem:[#allocation4 + $0x338] sm:$0xff] }
 0x181   : > { %4247 = vmatprep.subr.mxu1 %v2514_v46  ;;  %4291 = vmatprep.subr.mxu0 %v2652_v16 }
 0x182   : > { %4248 = vmatpush3.msra.mxu1 %v2514_v46  ;;  %4292 = vmatpush3.msra.mxu0 %v2652_v16  ;;  %v2924_v46 = vld [vmem:[#allocation4 + $0x3b8] sm:$0xff]  ;;  %v2785_v16 = vld [vmem:[#allocation4 + $0x330] sm:$0xff] }
 0x183   : > { %4192 = vmatmul.mubr.f32.gmra.mxu1 %v5134_v48  ;;  %4236 = vmatmul.mubr.f32.gmra.mxu0 %v5111_v9 }
 0x184   : > { %4249 = vmatprep.subr.mxu1 %v2513_v45  ;;  %4293 = vmatprep.subr.mxu0 %v2651_v54 }
 0x185   : > { %4194 = vmatprep.mubr.f32.mxu1 %v5138_v36  ;;  %4238 = vmatprep.mubr.f32.mxu0 %v5114_v11 }
 0x186   : > { %4250 = vmatpush3.msra.mxu1 %v2513_v45  ;;  %4294 = vmatpush3.msra.mxu0 %v2651_v54  ;;  %v2923_v45 = vld [vmem:[#allocation4 + $0x3b0] sm:$0xff]  ;;  %v2784_v54 = vld [vmem:[#allocation4 + $0x328] sm:$0xff] }
 0x187   : > { %4251 = vmatprep.subr.mxu1 %v2512_v37  ;;  %4295 = vmatprep.subr.mxu0 %v2650_v47 }
 0x188   : > { %4252 = vmatpush3.msra.mxu1 %v2512_v37  ;;  %4296 = vmatpush3.msra.mxu0 %v2650_v47  ;;  %v2922_v37 = vld [vmem:[#allocation4 + $0x3a8] sm:$0xff]  ;;  %v2782_v47 = vld [vmem:[#allocation4 + $0x318] sm:$0xff] }
 0x189   : > { %4195 = vmatmul.mubr.f32.gmra.mxu1 %v5142_v51  ;;  %4239 = vmatmul.mubr.f32.gmra.mxu0 %v5145_v57 }
 0x18a   : > { %4253 = vmatprep.subr.mxu1 %v2511_v55  ;;  %4297 = vmatprep.subr.mxu0 %v2649_v56 }
 0x18b   : > { %4254 = vmatpush3.msra.mxu1 %v2511_v55  ;;  %4273 = vmatprep.mubr.f32.mxu1 %v5059_v27  ;;  %v2506_v27 = vld [vmem:[#allocation4 + $0x220] sm:$0xff]  ;;  %v2920_v55 = vld [vmem:[#allocation4 + $0x398] sm:$0xff] }
 0x18c   : > { %4298 = vmatpush3.msra.mxu0 %v2649_v56  ;;  %4317 = vmatprep.mubr.f32.mxu0 %v5118_v31  ;;  %v2788_v31 = vld [vmem:[#allocation4 + $0x348] sm:$0xff]  ;;  %v2781_v56 = vld [vmem:[#allocation4 + $0x310] sm:$0xff] }
 0x18d   : > { %4255 = vmatprep.subr.mxu1 %v2510_v0  ;;  %4299 = vmatprep.subr.mxu0 %v2648_v61 }
 0x18e   : > { %4256 = vmatpush3.msra.mxu1 %v2510_v0  ;;  %4300 = vmatpush3.msra.mxu0 %v2648_v61  ;;  %v2919_v0 = vld [vmem:[#allocation4 + $0x390] sm:$0xff]  ;;  %v2780_v61 = vld [vmem:[#allocation4 + $0x308] sm:$0xff] }
 0x18f   : > { %4257 = vmatprep.subr.mxu1 %v2509_v60  ;;  %4301 = vmatprep.subr.mxu0 %v2647_v52 }
 0x190   : > { %4258 = vmatpush3.msra.mxu1 %v2509_v60  ;;  %4302 = vmatpush3.msra.mxu0 %v2647_v52  ;;  %v2918_v60 = vld [vmem:[#allocation4 + $0x388] sm:$0xff]  ;;  %v2779_v52 = vld [vmem:[#allocation4 + $0x300] sm:$0xff] }
 0x191   : > { %4259 = vmatprep.subr.mxu1 %v2508_v1  ;;  %4303 = vmatprep.subr.mxu0 %v2646_v2 }
 0x192   : > { %4260 = vmatpush3.msra.mxu1 %v2508_v1  ;;  %4304 = vmatpush3.msra.mxu0 %v2646_v2  ;;  %v2917_v1 = vld [vmem:[#allocation4 + $0x380] sm:$0xff]  ;;  %v3070_v2 = vld [vmem:[#allocation4 + $0x478] sm:$0xff] }
 0x193   : > { %4261 = vmatprep.subr.mxu1 %v2507_v8  ;;  %4305 = vmatprep.subr.mxu0 %v2645_v6 }
 0x194   : > { %4262 = vmatpush3.msra.mxu1 %v2507_v8  ;;  %4306 = vmatpush3.msra.mxu0 %v2645_v6  ;;  %v3214_v8 = vld [vmem:[%s5410_s7] sm:$0xf] }
 0x195   : > { %4263 = vmatprep.subr.mxu1 %v2506_v27  ;;  %4307 = vmatprep.subr.mxu0 %v2644_v10  ;;  %v3069_v6 = vld [vmem:[#allocation4 + $0x470] sm:$0xff] }
 0x196   : > { %4264 = vmatpush3.msra.mxu1 %v2506_v27  ;;  %4308 = vmatpush3.msra.mxu0 %v2644_v10  ;;  %v3068_v27 = vld [vmem:[#allocation4 + $0x468] sm:$0xff]  ;;  %v3059_v10 = vld [vmem:[#allocation4 + $0x420] sm:$0xff] }
 0x197   : > { %4265 = vmatprep.subr.mxu1 %v2505_v12  ;;  %4309 = vmatprep.subr.mxu0 %v2643_v5 }
 0x198   : > { %4266 = vmatpush3.msra.mxu1 %v2505_v12  ;;  %4310 = vmatpush3.msra.mxu0 %v2643_v5  ;;  %v4534_v12 = vld [vmem:[#allocation2 + $0xe8] ss:$2 sm:$0xff] }
 0x199   : > { %4267 = vmatprep.subr.mxu1 %v2504_v13  ;;  %4311 = vmatprep.subr.mxu0 %v2642_v14  ;;  %v3058_v5 = vld [vmem:[#allocation4 + $0x418] sm:$0xff] }
 0x19a   : > { %4268 = vmatpush3.msra.mxu1 %v2504_v13  ;;  %4312 = vmatpush3.msra.mxu0 %v2642_v14  ;;  %v4535_v13 = vld [vmem:[#allocation2 + $0x128] ss:$2 sm:$0xff]  ;;  %v3057_v14 = vld [vmem:[#allocation4 + $0x410] sm:$0xff] }
 0x19b   : > { %4269 = vmatprep.subr.mxu1 %v2503_v15  ;;  %4313 = vmatprep.subr.mxu0 %v2641_v17 }
 0x19c   : > { %4270 = vmatpush3.msra.mxu1 %v2503_v15  ;;  %4314 = vmatpush3.msra.mxu0 %v2641_v17  ;;  %v4536_v15 = vld [vmem:[#allocation2 + $0x168] ss:$2 sm:$0xff]  ;;  %v3056_v17 = vld [vmem:[#allocation4 + $0x408] sm:$0xff] }
 0x19d   : > { %4271 = vmatprep.subr.mxu1 %v2502_v18  ;;  %4315 = vmatprep.subr.mxu0 %v2640_v19 }
 0x19e   : > { %4272 = vmatpush3.msra.mxu1 %v2502_v18  ;;  %4316 = vmatpush3.msra.mxu0 %v2640_v19  ;;  %v4537_v18 = vld [vmem:[#allocation2 + $0x1a8] ss:$2 sm:$0xff] }
 0x19f   : > { %4274 = vmatmul.mubr.f32.vlgmr.msra.gmra.mxu1 %v5054_v20  ;;  %4318 = vmatmul.mubr.f32.vlgmr.msra.gmra.mxu0 %v5122_v42  ;;  %v3055_v19 = vld [vmem:[#allocation4 + $0x400] sm:$0xff] }
 0x1a0   : > { %4329 = vmatprep.subr.mxu1 %v2794_v22  ;;  %4373 = vmatprep.subr.mxu0 %v2932_v23 }
 0x1a1   : > { %4276 = vmatprep.mubr.f32.mxu1 %v5072_v34  ;;  %4320 = vmatprep.mubr.f32.mxu0 %v5126_v43 }
 0x1a2   : > { %4330 = vmatpush3.msra.mxu1 %v2794_v22  ;;  %4374 = vmatpush3.msra.mxu0 %v2932_v23  ;;  %v4538_v22 = vld [vmem:[#allocation2 + $0x1e8] ss:$2 sm:$0xff] }
 0x1a3   : > { %4331 = vmatprep.subr.mxu1 %v2793_v24  ;;  %4375 = vmatprep.subr.mxu0 %v2931_v25  ;;  %v3053_v23 = vld [vmem:[#allocation3 + $0xe1] sm:$0xff] }
 0x1a4   : > { %4332 = vmatpush3.msra.mxu1 %v2793_v24  ;;  %4376 = vmatpush3.msra.mxu0 %v2931_v25 }
 0x1a5   : > { %4277 = vmatmul.mubr.f32.gmra.mxu1 %v5064_v39  ;;  %4321 = vmatmul.mubr.f32.gmra.mxu0 %v5130_v35 }
 0x1a6   : > { %4333 = vmatprep.subr.mxu1 %v2792_v38  ;;  %4377 = vmatprep.subr.mxu0 %v2930_v4 }
 0x1a7   : > { %4279 = vmatprep.mubr.f32.mxu1 %v5084_v50  ;;  %4323 = vmatprep.mubr.f32.mxu0 %v5134_v48 }
 0x1a8   : > { %4334 = vmatpush3.msra.mxu1 %v2792_v38  ;;  %4378 = vmatpush3.msra.mxu0 %v2930_v4 }
 0x1a9   : > { %4335 = vmatprep.subr.mxu1 %v2791_v26  ;;  %4379 = vmatprep.subr.mxu0 %v2929_v40 }
 0x1aa   : > { %4336 = vmatpush3.msra.mxu1 %v2791_v26  ;;  %4380 = vmatpush3.msra.mxu0 %v2929_v40 }
 0x1ab   : > { %4280 = vmatmul.mubr.f32.gmra.mxu1 %v5077_v53  ;;  %4324 = vmatmul.mubr.f32.gmra.mxu0 %v5138_v36 }
 0x1ac   : > { %4337 = vmatprep.subr.mxu1 %v2790_v7  ;;  %4381 = vmatprep.subr.mxu0 %v2928_v28 }
 0x1ad   : > { %4282 = vmatprep.mubr.f32.mxu1 %v5097_v49  ;;  %4326 = vmatprep.mubr.f32.mxu0 %v5142_v51 }
 0x1ae   : > { %4338 = vmatpush3.msra.mxu1 %v2790_v7  ;;  %4382 = vmatpush3.msra.mxu0 %v2928_v28 }
 0x1af   : > { %4339 = vmatprep.subr.mxu1 %v2789_v29  ;;  %4383 = vmatprep.subr.mxu0 %v2927_v30 }
 0x1b0   : > { %4340 = vmatpush3.msra.mxu1 %v2789_v29  ;;  %4384 = vmatpush3.msra.mxu0 %v2927_v30 }
 0x1b1   : > { %4283 = vmatmul.mubr.f32.gmra.mxu1 %v5089_v58  ;;  %4327 = vmatmul.mubr.f32.gmra.mxu0 %v5163_v32 }
 0x1b2   : > { %4341 = vmatprep.subr.mxu1 %v2788_v31  ;;  %4385 = vmatprep.subr.mxu0 %v2926_v41 }
 0x1b3   : > { %4342 = vmatpush3.msra.mxu1 %v2788_v31  ;;  %4361 = vmatprep.mubr.f32.mxu1 %v5092_v59  ;;  %v2783_v59 = vld [vmem:[#allocation4 + $0x320] sm:$0xff] }
 0x1b4   : > { %4386 = vmatpush3.msra.mxu0 %v2926_v41  ;;  %4405 = vmatprep.mubr.f32.mxu0 %v5054_v20  ;;  %v2921_v20 = vld [vmem:[#allocation4 + $0x3a0] sm:$0xff] }
 0x1b5   : > { %4343 = vmatprep.subr.mxu1 %v2787_v33  ;;  %4387 = vmatprep.subr.mxu0 %v2925_v44 }
 0x1b6   : > { %4344 = vmatpush3.msra.mxu1 %v2787_v33  ;;  %4388 = vmatpush3.msra.mxu0 %v2925_v44 }
 0x1b7   : > { %4345 = vmatprep.subr.mxu1 %v2786_v21  ;;  %4389 = vmatprep.subr.mxu0 %v2924_v46 }
 0x1b8   : > { %4346 = vmatpush3.msra.mxu1 %v2786_v21  ;;  %4390 = vmatpush3.msra.mxu0 %v2924_v46 }
 0x1b9   : > { %4347 = vmatprep.subr.mxu1 %v2785_v16  ;;  %4391 = vmatprep.subr.mxu0 %v2923_v45 }
 0x1ba   : > { %4348 = vmatpush3.msra.mxu1 %v2785_v16  ;;  %4392 = vmatpush3.msra.mxu0 %v2923_v45 }
 0x1bb   : > { %4349 = vmatprep.subr.mxu1 %v2784_v54  ;;  %4393 = vmatprep.subr.mxu0 %v2922_v37 }
 0x1bc   : > { %4350 = vmatpush3.msra.mxu1 %v2784_v54  ;;  %4394 = vmatpush3.msra.mxu0 %v2922_v37 }
 0x1bd   : > { %4351 = vmatprep.subr.mxu1 %v2783_v59  ;;  %4395 = vmatprep.subr.mxu0 %v2921_v20 }
 0x1be   : > { %4352 = vmatpush3.msra.mxu1 %v2783_v59  ;;  %4396 = vmatpush3.msra.mxu0 %v2921_v20 }
 0x1bf   : > { %4353 = vmatprep.subr.mxu1 %v2782_v47  ;;  %4397 = vmatprep.subr.mxu0 %v2920_v55 }
 0x1c0   : > { %4354 = vmatpush3.msra.mxu1 %v2782_v47  ;;  %4398 = vmatpush3.msra.mxu0 %v2920_v55 }
 0x1c1   : > { %4355 = vmatprep.subr.mxu1 %v2781_v56  ;;  %4399 = vmatprep.subr.mxu0 %v2919_v0 }
 0x1c2   : > { %4356 = vmatpush3.msra.mxu1 %v2781_v56  ;;  %4400 = vmatpush3.msra.mxu0 %v2919_v0 }
 0x1c3   : > { %4357 = vmatprep.subr.mxu1 %v2780_v61  ;;  %4401 = vmatprep.subr.mxu0 %v2918_v60 }
 0x1c4   : > { %4358 = vmatpush3.msra.mxu1 %v2780_v61  ;;  %4402 = vmatpush3.msra.mxu0 %v2918_v60 }
 0x1c5   : > { %4359 = vmatprep.subr.mxu1 %v2779_v52  ;;  %4403 = vmatprep.subr.mxu0 %v2917_v1 }
 0x1c6   : > { %4360 = vmatpush3.msra.mxu1 %v2779_v52  ;;  %4404 = vmatpush3.msra.mxu0 %v2917_v1 }
 0x1c7   : > { %4362 = vmatmul.mubr.f32.vlgmr.msra.gmra.mxu1 %v5100_v62  ;;  %4406 = vmatmul.mubr.f32.vlgmr.msra.gmra.mxu0 %v5072_v34  ;;  %v3067_v62 = vld [vmem:[#allocation4 + $0x460] sm:$0xff]  ;;  %v3066_v34 = vld [vmem:[#allocation4 + $0x458] sm:$0xff] }
 0x1c8   : > { %4417 = vmatprep.subr.mxu1 %v3070_v2  ;;  %4364 = vmatprep.mubr.f32.mxu1 %v5104_v63  ;;  %v2777_v63 = vld [vmem:[#allocation3 + $0xdf] sm:$0xff] }
 0x1c9   : > { %4408 = vmatprep.mubr.f32.mxu0 %v5064_v39  ;;  %4418 = vmatpush3.msra.mxu1 %v3070_v2  ;;  %v3065_v39 = vld [vmem:[#allocation4 + $0x450] sm:$0xff] }
 0x1ca   : > { %4461 = vmatprep.subr.msk.mxu0 %vm540_vm2, %v3214_v8  ;;  %4419 = vmatprep.subr.mxu1 %v3069_v6 }
 0x1cb   : > { %4365 = vmatmul.mubr.f32.gmra.mxu1 %v5108_v3  ;;  %4409 = vmatmul.mubr.f32.gmra.mxu0 %v5084_v50  ;;  %v3064_v50 = vld [vmem:[#allocation4 + $0x448] sm:$0xff]  ;;  %v4530_v3 = vld [vmem:[#allocation3] sm:$0xff] }
 0x1cc   : > { %4420 = vmatpush3.msra.mxu1 %v3069_v6  ;;  %4367 = vmatprep.mubr.f32.mxu1 %v5111_v9  ;;  %v4531_v9 = vld [vmem:[#allocation2 + $0x28] ss:$2 sm:$0xff] }
 0x1cd   : > { %4421 = vmatprep.subr.mxu1 %v3068_v27  ;;  %4411 = vmatprep.mubr.f32.mxu0 %v5077_v53  ;;  %v3063_v53 = vld [vmem:[#allocation4 + $0x440] sm:$0xff] }
 0x1ce   : > { %4422 = vmatpush3.msra.mxu1 %v3068_v27  ;;  %4462 = vmatpush3.msk.msra.mxu0 %vm540_vm2, %v3214_v8 }
 0x1cf   : > { %4423 = vmatprep.subr.mxu1 %v3067_v62  ;;  %4368 = vmatmul.mubr.f32.gmra.mxu1 %v5114_v11  ;;  %v4532_v11 = vld [vmem:[#allocation2 + $0x68] ss:$2 sm:$0xff] }
 0x1d0   : > { %4424 = vmatpush3.msra.mxu1 %v3067_v62  ;;  %4412 = vmatmul.mubr.f32.gmra.mxu0 %v5097_v49  ;;  %v3062_v49 = vld [vmem:[#allocation4 + $0x438] sm:$0xff] }
 0x1d1   : > { %4425 = vmatprep.subr.mxu1 %v3066_v34  ;;  %4370 = vmatprep.mubr.f32.mxu1 %v5145_v57  ;;  %v4533_v57 = vld [vmem:[#allocation2 + $0xa8] ss:$2 sm:$0xff] }
 0x1d2   : > { %4414 = vmatprep.mubr.f32.mxu0 %v5089_v58  ;;  %4426 = vmatpush3.msra.mxu1 %v3066_v34  ;;  %v3061_v58 = vld [vmem:[#allocation4 + $0x430] sm:$0xff] }
 0x1d3   : > { %4427 = vmatprep.subr.mxu1 %v3065_v39  ;;  %4371 = vmatmul.mubr.f32.gmra.mxu1 %v2777_v63 }
 0x1d4   : > { %4428 = vmatpush3.msra.mxu1 %v3065_v39  ;;  %4449 = vmatprep.mubr.f32.mxu1 %v5122_v42  ;;  %v3060_v42 = vld [vmem:[#allocation4 + $0x428] sm:$0xff] }
 0x1d5   : > { %4429 = vmatprep.subr.mxu1 %v3064_v50  ;;  %4415 = vmatmul.mubr.f32.gmra.mxu0 %v4530_v3 }
 0x1d6   : > { %4430 = vmatpush3.msra.mxu1 %v3064_v50  ;;  %4463 = vmatprep.mubr.msk.f32.mxu0 %vm406_vm0, %v4531_v9 }
 0x1d7   : > { %4431 = vmatprep.subr.mxu1 %v3063_v53 }
 0x1d8   : > { %4432 = vmatpush3.msra.mxu1 %v3063_v53 }
 0x1d9   : > { %4433 = vmatprep.subr.mxu1 %v3062_v49  ;;  %4464 = vmatmul.mubr.msk.f32.vlgmr.msra.gmra.mxu0 %vm406_vm0, %v4532_v11 }
 0x1da   : > { %4434 = vmatpush3.msra.mxu1 %v3062_v49  ;;  %4466 = vmatprep.mubr.msk.f32.mxu0 %vm406_vm0, %v4533_v57 }
 0x1db   : > { %4435 = vmatprep.subr.mxu1 %v3061_v58 }
 0x1dc   : > { %4436 = vmatpush3.msra.mxu1 %v3061_v58 }
 0x1dd   : > { %4437 = vmatprep.subr.mxu1 %v3060_v42  ;;  %4467 = vmatmul.mubr.msk.f32.gmra.mxu0 %vm406_vm0, %v4534_v12 }
 0x1de   : > { %4438 = vmatpush3.msra.mxu1 %v3060_v42  ;;  %4469 = vmatprep.mubr.msk.f32.mxu0 %vm406_vm0, %v4535_v13 }
 0x1df   : > { %4439 = vmatprep.subr.mxu1 %v3059_v10 }
 0x1e0   : > { %4440 = vmatpush3.msra.mxu1 %v3059_v10 }
 0x1e1   : > { %4441 = vmatprep.subr.mxu1 %v3058_v5  ;;  %4470 = vmatmul.mubr.msk.f32.gmra.mxu0 %vm406_vm0, %v4536_v15 }
 0x1e2   : > { %4442 = vmatpush3.msra.mxu1 %v3058_v5  ;;  %4472 = vmatprep.mubr.msk.f32.mxu0 %vm406_vm0, %v4537_v18 }
 0x1e3   : > { %4443 = vmatprep.subr.mxu1 %v3057_v14 }
 0x1e4   : > { %4444 = vmatpush3.msra.mxu1 %v3057_v14 }
 0x1e5   : > { %4445 = vmatprep.subr.mxu1 %v3056_v17  ;;  %4473 = vmatmul.mubr.msk.f32.gmra.mxu0 %vm406_vm0, %v4538_v22 }
 0x1e6   : > { %4446 = vmatpush3.msra.mxu1 %v3056_v17 }
 0x1e7   : > { %4447 = vmatprep.subr.mxu1 %v3055_v19 }
 0x1e8   : > { %4448 = vmatpush3.msra.mxu1 %v3055_v19 }
 0x1e9   : > { %4450 = vmatmul.mubr.f32.vlgmr.msra.gmra.mxu1 %v5126_v43 }
 0x1ea   : > { %4452 = vmatprep.mubr.f32.mxu1 %v5130_v35 }
 0x1ed   : > { %4453 = vmatmul.mubr.f32.gmra.mxu1 %v5134_v48 }
 0x1ee   : > { %4455 = vmatprep.mubr.f32.mxu1 %v5138_v36 }
 0x1f1   : > { %4456 = vmatmul.mubr.f32.gmra.mxu1 %v5142_v51 }
 0x1f2   : > { %4458 = vmatprep.mubr.f32.mxu1 %v5163_v32 }
 0x1f5   : > { %4459 = vmatmul.mubr.f32.gmra.mxu1 %v3053_v23 }
 0x20d   : > { %v4099_v25 = vpop.f32.mrf.mxu1 }
 0x20f   : > { %v2073_v4 = vpop.f32.mrf.mxu1 }
 0x212   : > { %v4102_v40 = vpop.f32.mrf.mxu1 }
 0x214   : > { %v5204_v35 = vpop.f32.mrf.mxu1 }
 0x215   : > { %v4143_v24 = vpop.f32.mrf.mxu0 }
 0x216   : > { %v2184_v22 = vadd.f32 %v4143_v24, %v4099_v25 }
 0x217   : > { %v2178_v38 = vpop.f32.mrf.mxu0 }
 0x218   : > { %v5208_v36 = vpop.f32.mrf.mxu1 }
 0x21a   : > { %v5200_v26 = vpop.f32.mrf.mxu0  ;;  %v2093_v7 = vpop.f32.mrf.mxu1 }
 0x21c   : > { %v5202_v43 = vpop.f32.mrf.mxu0 }
 0x21e   : > { %v5206_v48 = vpop.f32.mrf.mxu0 }
 0x220   : > { %v5210_v51 = vpop.f32.mrf.mxu0 }
 0x221   : > { %v4108_v29 = vpop.f32.mrf.mxu1 }
 0x222   : > { %v4152_v28 = vpop.f32.mrf.mxu0 }
 0x223   : > { %v2103_v41 = vpop.f32.mrf.mxu1 }
 0x224   : > { %v5212_v30 = vpop.f32.mrf.mxu0 }
 0x237   : > { %v4231_v31 = vpop.f32.mrf.mxu0  ;;  %v4187_v32 = vpop.f32.mrf.mxu1 }
 0x239   : > { %v2446_v33 = vpop.f32.mrf.mxu0  ;;  %v2308_v44 = vpop.f32.mrf.mxu1 }
 0x23d   : > { %v5214_v21 = vpop.f32.mrf.mxu0  ;;  %v4190_v46 = vpop.f32.mrf.mxu1 }
 0x23f   : > { %v5216_v16 = vpop.f32.mrf.mxu0  ;;  %v2318_v45 = vpop.f32.mrf.mxu1 }
 0x243   : > { %v5218_v54 = vpop.f32.mrf.mxu0  ;;  %v4193_v37 = vpop.f32.mrf.mxu1 }
 0x245   : > { %v5220_v59 = vpop.f32.mrf.mxu0  ;;  %v2328_v20 = vpop.f32.mrf.mxu1 }
 0x249   : > { %v5222_v47 = vpop.f32.mrf.mxu0  ;;  %v4196_v55 = vpop.f32.mrf.mxu1 }
 0x24b   : > { %v5224_v56 = vpop.f32.mrf.mxu0  ;;  %v2338_v61 = vpop.f32.mrf.mxu1 }
 0x25f   : > { %v4319_v0 = vpop.f32.mrf.mxu0  ;;  %v4275_v60 = vpop.f32.mrf.mxu1 }
 0x261   : > { %v2722_v52 = vpop.f32.mrf.mxu0  ;;  %v2584_v1 = vpop.f32.mrf.mxu1 }
 0x265   : > { %v5226_v2 = vpop.f32.mrf.mxu0  ;;  %v4278_v8 = vpop.f32.mrf.mxu1 }
 0x267   : > { %v5228_v6 = vpop.f32.mrf.mxu0  ;;  %v2594_v27 = vpop.f32.mrf.mxu1 }
 0x26b   : > { %v5230_v62 = vpop.f32.mrf.mxu0  ;;  %v4281_v34 = vpop.f32.mrf.mxu1 }
 0x26d   : > { %v5232_v39 = vpop.f32.mrf.mxu0  ;;  %v2604_v63 = vpop.f32.mrf.mxu1 }
 0x271   : > { %v5234_v50 = vpop.f32.mrf.mxu0  ;;  %v5236_v53 = vpop.f32.mrf.mxu1 }
 0x272   : > { %5429 = vst [vmem:[#allocation12_spill] sm:$0xff] %v5234_v50  ;;  %5430 = vst [vmem:[#allocation13_spill] sm:$0xff] %v5236_v53  ;;  %v2348_v50 = vadd.f32 %v4187_v32, %v2184_v22  ;;  %v2214_v53 = vadd.f32 %v4152_v28, %v4108_v29  ;;  %v5272_v28 = vld [vmem:[%s5411_s8] ss:$0 sm:$0xff] }
 0x273   : > { %v5238_v3 = vpop.f32.mrf.mxu0  ;;  %v5240_v9 = vpop.f32.mrf.mxu1 }
 0x274   : > { %5431 = vst [vmem:[#allocation14_spill] sm:$0xff] %v5238_v3  ;;  %5432 = vst [vmem:[#allocation10_spill] sm:$0xff] %v5240_v9  ;;  %v2179_v3 = vadd.f32 %v2178_v38, %v2073_v4  ;;  %v2209_v4 = vadd.f32 %v5212_v30, %v2103_v41 }
 0x287   : > { %v4407_v49 = vpop.f32.mrf.mxu0  ;;  %v4363_v11 = vpop.f32.mrf.mxu1 }
 0x289   : > { %v5242_v58 = vpop.f32.mrf.mxu0  ;;  %v2861_v10 = vpop.f32.mrf.mxu1 }
 0x28a   : > { %5433 = vst [vmem:[#allocation11_spill] sm:$0xff] %v5242_v58  ;;  %v2486_v58 = vadd.f32 %v4231_v31, %v2348_v50 }
 0x28b   : > { %v5244_v42 = vpop.f32.mrf.mxu0  ;;  %v4366_v13 = vpop.f32.mrf.mxu1 }
 0x28c   : > { %5434 = vst [vmem:[#allocation15_spill] sm:$0xff] %v5244_v42  ;;  %v2624_v38 = vadd.f32 %v4275_v60, %v2486_v58 }
 0x28d   : > { %v5246_v57 = vpop.f32.mrf.mxu0  ;;  %v2871_v15 = vpop.f32.mrf.mxu1 }
 0x28e   : > { %5435 = vst [vmem:[#allocation16_spill] sm:$0xff] %v5246_v57  ;;  %v2194_v57 = vadd.f32 %v5200_v26, %v4102_v40  ;;  %v2762_v50 = vadd.f32 %v4319_v0, %v2624_v38 }
 0x28f   : > { %v4369_v19 = vpop.f32.mrf.mxu1 }
 0x290   : > { %v5248_v12 = vpop.f32.mrf.mxu0  ;;  %v2350_v25 = vadd.f32 %v4190_v46, %v2194_v57 }
 0x291   : > { %5436 = vst [vmem:[#allocation17_spill] sm:$0xff] %v5248_v12  ;;  %v5256_v42 = vpop.f32.mrf.mxu1  ;;  %v2347_v12 = vadd.f32 %v2308_v44, %v2179_v3  ;;  %v2354_v44 = vadd.f32 %v4196_v55, %v2214_v53 }
 0x292   : > { %v5250_v5 = vpop.f32.mrf.mxu0  ;;  %v2488_v31 = vadd.f32 %v5214_v21, %v2350_v25 }
 0x293   : > { %5437 = vst [vmem:[#allocation18_spill] sm:$0xff] %v5250_v5  ;;  %v2189_v5 = vadd.f32 %v5202_v43, %v5204_v35  ;;  %v2485_v24 = vadd.f32 %v2446_v33, %v2347_v12  ;;  %v4372_v40 = vpop.f32.mrf.mxu1  ;;  %v2492_v29 = vadd.f32 %v5222_v47, %v2354_v44  ;;  %v2901_v33 = vadd.f32 %v4363_v11, %v2762_v50 }
 0x294   : > { %v2626_v41 = vadd.f32 %v4278_v8, %v2488_v31  ;;  %v5285_v8 = vld [vmem:[%s5408_s5] ss:$0 sm:$0xff] }
 0x295   : > { %v5252_v14 = vpop.f32.mrf.mxu0  ;;  %v2349_v32 = vadd.f32 %v2318_v45, %v2189_v5  ;;  %v2623_v43 = vadd.f32 %v2584_v1, %v2485_v24  ;;  %v5446_v25 = vld [vmem:[#allocation16_spill] sm:$0xff] }
 0x296   : > { %5438 = vst [vmem:[#allocation19_spill] sm:$0xff] %v5252_v14  ;;  %v2204_v14 = vadd.f32 %v5206_v48, %v5208_v36 }
 0x297   : > { %v5254_v17 = vpop.f32.mrf.mxu0  ;;  %v2487_v48 = vadd.f32 %v5216_v16, %v2349_v32  ;;  %v2761_v30 = vadd.f32 %v2722_v52, %v2623_v43  ;;  %v5440_v52 = vld [vmem:[#allocation13_spill] sm:$0xff] }
 0x298   : > { %5439 = vst [vmem:[#allocation20_spill] sm:$0xff] %v5254_v17  ;;  %v2199_v17 = vadd.f32 %v5210_v51, %v2093_v7  ;;  %v2352_v22 = vadd.f32 %v4193_v37, %v2204_v14  ;;  %v2353_v7 = vadd.f32 %v2338_v61, %v2209_v4  ;;  %v2891_v37 = vpop.f32.mrf.mxu1  ;;  %v5447_v4 = vld [vmem:[#allocation17_spill] sm:$0xff] }
 0x299   : > { %v4465_v18 = vpop.f32.mrf.mxu0  ;;  %v2625_v46 = vadd.f32 %v2594_v27, %v2487_v48  ;;  %v5441_v27 = vld [vmem:[#allocation10_spill] sm:$0xff] }
 0x29a   : > { %v2351_v26 = vadd.f32 %v2328_v20, %v2199_v17  ;;  %v2490_v36 = vadd.f32 %v5218_v54, %v2352_v22  ;;  %v2491_v21 = vadd.f32 %v5224_v56, %v2353_v7  ;;  %v2764_v54 = vadd.f32 %v5226_v2, %v2626_v41  ;;  %v5290_v2 = vld [vmem:[%s5412_s9] ss:$0 sm:$0xff]  ;;  %v5448_v41 = vld [vmem:[#allocation18_spill] sm:$0xff] }
 0x29b   : > { %v3284_v23 = vpop.f32.mrf.mxu0  ;;  %v2900_v20 = vadd.f32 %v2861_v10, %v2761_v30  ;;  %v3331_v55 = vmul.f32 %v4465_v18, %v5272_v28  ;;  %v2763_v61 = vadd.f32 %v5228_v6, %v2625_v46  ;;  %v2630_v56 = vadd.f32 %v5440_v52, %v2492_v29  ;;  %v5442_v6 = vld [vmem:[#allocation11_spill] sm:$0xff]  ;;  %v5444_v17 = vld [vmem:[#allocation12_spill] sm:$0xff] }
 0x29c   : > { %v2489_v51 = vadd.f32 %v5220_v59, %v2351_v26  ;;  %v2628_v45 = vadd.f32 %v4281_v34, %v2490_v36  ;;  %v3039_v59 = vadd.f32 %v4407_v49, %v2901_v33  ;;  %v2629_v34 = vadd.f32 %v5441_v27, %v2491_v21  ;;  %v5297_v49 = vld [vmem:[%s5409_s6] ss:$0 sm:$0xff]  ;;  %v5443_v10 = vld [vmem:[#allocation15_spill] sm:$0xff] }
 0x29d   : > { %v4468_v9 = vpop.f32.mrf.mxu0  ;;  %v3330_v11 = vmul.f32 %v5272_v28, %v3284_v23  ;;  %v2768_v18 = vadd.f32 %v5444_v17, %v2630_v56  ;;  %v5449_v46 = vld [vmem:[#allocation19_spill] sm:$0xff] }
 0x29e   : > { %v2627_v16 = vadd.f32 %v2604_v63, %v2489_v51  ;;  %v2766_v47 = vadd.f32 %v5230_v62, %v2628_v45  ;;  %v3038_v63 = vadd.f32 %v5442_v6, %v2900_v20  ;;  %v2903_v62 = vadd.f32 %v4366_v13, %v2764_v54 }
 0x29f   : > { %v3294_v35 = vpop.f32.mrf.mxu0  ;;  %v3333_v57 = vmul.f32 %v4468_v9, %v5272_v28  ;;  %v3346_v13 = vadd.f32 %v5290_v2, %v3331_v55  ;;  %v2907_v44 = vadd.f32 %v4372_v40, %v2768_v18  ;;  %v3345_v50 = vadd.f32 %v5290_v2, %v3330_v11 }
 0x2a0   : > { %v2765_v60 = vadd.f32 %v5232_v39, %v2627_v16  ;;  %v2902_v39 = vadd.f32 %v2871_v15, %v2763_v61  ;;  %v2905_v3 = vadd.f32 %v4369_v19, %v2766_v47  ;;  %v3041_v12 = vadd.f32 %v5443_v10, %v2903_v62  ;;  %v5445_v19 = vld [vmem:[#allocation14_spill] sm:$0xff] }
 0x2a1   : > { %v4471_v0 = vpop.f32.mrf.mxu0  ;;  %v2767_v24 = vadd.f32 %v5445_v19, %v2629_v34  ;;  %v3348_v43 = vadd.f32 %v5290_v2, %v3333_v57  ;;  %v3332_v36 = vmul.f32 %v5272_v28, %v3294_v35  ;;  %v3045_v45 = vadd.f32 %v5449_v46, %v2907_v44  ;;  %v5450_v34 = vld [vmem:[#allocation20_spill] sm:$0xff] }
 0x2a2   : > { %v3040_v38 = vadd.f32 %v5446_v25, %v2902_v39  ;;  %v3043_v32 = vadd.f32 %v5447_v4, %v2905_v3  ;;  %v2904_v23 = vadd.f32 %v5256_v42, %v2765_v60  ;;  %v3335_v16 = vmul.f32 %v4471_v0, %v5272_v28 }
 0x2a3   : > { %v3304_v15 = vpop.f32.mrf.mxu0  ;;  %v2906_v21 = vadd.f32 %v2891_v37, %v2767_v24  ;;  %v3347_v55 = vadd.f32 %v5290_v2, %v3332_v36 }
 0x2a4   : > { %v3042_v33 = vadd.f32 %v5448_v41, %v2904_v23  ;;  %v3334_v60 = vmul.f32 %v5272_v28, %v3304_v15  ;;  %v3350_v62 = vadd.f32 %v5290_v2, %v3335_v16 }
 0x2a5   : > { %v4474_v30 = vpop.f32.mrf.mxu0  ;;  %v3044_v6 = vadd.f32 %v5450_v34, %v2906_v21 }
 0x2a6   : > { %v3337_v52 = vmul.f32 %v4474_v30, %v5272_v28  ;;  %v3349_v10 = vadd.f32 %v5290_v2, %v3334_v60 }
 0x2a7   : > { %v3314_v27 = vpop.f32.mrf.mxu0 }
 0x2a9   : > { %v4451_v1 = vpop.f32.mrf.mxu1 }
 0x2aa   : > { %v3177_v53 = vadd.f32 %v4451_v1, %v3039_v59 }
 0x2ab   : > { %v3137_v58 = vpop.f32.mrf.mxu1 }
 0x2ac   : > { %v3192_v5 = vmul.f32 %v5285_v8, %v3177_v53  ;;  %v3176_v14 = vadd.f32 %v3137_v58, %v3038_v63 }
 0x2ad   : > { %v4454_v22 = vpop.f32.mrf.mxu1 }
 0x2ae   : > { %v3207_v9 = vadd.f32 %v5297_v49, %v3192_v5  ;;  %v3191_v26 = vmul.f32 %v5285_v8, %v3176_v14  ;;  %v3179_v31 = vadd.f32 %v4454_v22, %v3041_v12  ;;  %v3352_v12 = vadd.f32 %v5290_v2, %v3337_v52 }
 0x2af   : > { %v3147_v48 = vpop.f32.mrf.mxu1 }
 0x2b0   : > { %v3354_v51 = vadd.f32 %v3346_v13, %v3207_v9  ;;  %v3206_v7 = vadd.f32 %v5297_v49, %v3191_v26  ;;  %v3194_v42 = vmul.f32 %v5285_v8, %v3179_v31  ;;  %v3178_v29 = vadd.f32 %v3147_v48, %v3040_v38 }
 0x2b1   : > { %v4457_v40 = vpop.f32.mrf.mxu1  ;;  %v3336_v13 = vmul.f32 %v5272_v28, %v3314_v27 }
 0x2b2   : > { %v3362_v54 = vmax.f32 %v3354_v51, 0.0  ;;  %v3353_v59 = vadd.f32 %v3345_v50, %v3206_v7  ;;  %v3209_v20 = vadd.f32 %v5297_v49, %v3194_v42  ;;  %v3193_v35 = vmul.f32 %v5285_v8, %v3178_v29 }
 0x2b3   : > { %v3181_v61 = vadd.f32 %v4457_v40, %v3043_v32  ;;  %v3157_v47 = vpop.f32.mrf.mxu1  ;;  %v3351_v23 = vadd.f32 %v5290_v2, %v3336_v13 }
 0x2b4   : > { %3370 = vst [vmem:[%s5327_s29 + $0x8] sm:$0xff] %v3362_v54  ;;  %v3361_v37 = vmax.f32 %v3353_v59, 0.0  ;;  %v3356_v0 = vadd.f32 %v3348_v43, %v3209_v20  ;;  %v3208_v56 = vadd.f32 %v5297_v49, %v3193_v35  ;;  %v3180_v1 = vadd.f32 %v3157_v47, %v3042_v33 }
 0x2b5   : > { %v3196_v63 = vmul.f32 %v5285_v8, %v3181_v61  ;;  %v4460_v53 = vpop.f32.mrf.mxu1 }
 0x2b6   : > { %3369 = vst [vmem:[%s5327_s29] sm:$0xff] %v3361_v37  ;;  %v3364_v39 = vmax.f32 %v3356_v0, 0.0  ;;  %v3355_v3 = vadd.f32 %v3347_v55, %v3208_v56  ;;  %v3195_v58 = vmul.f32 %v5285_v8, %v3180_v1  ;;  %v3183_v11 = vadd.f32 %v4460_v53, %v3045_v45 }
 0x2b7   : > { %v3211_v57 = vadd.f32 %v5297_v49, %v3196_v63  ;;  %v3167_v5 = vpop.f32.mrf.mxu1 }
 0x2b8   : > { %3372 = vst [vmem:[%s5327_s29 + $0x18] sm:$0xff] %v3364_v39  ;;  %v3363_v14 = vmax.f32 %v3355_v3, 0.0  ;;  %v3210_v15 = vadd.f32 %v5297_v49, %v3195_v58  ;;  %v3198_v17 = vmul.f32 %v5285_v8, %v3183_v11  ;;  %v3182_v18 = vadd.f32 %v3167_v5, %v3044_v6 }
 0x2b9   : > { %v3358_v19 = vadd.f32 %v3350_v62, %v3211_v57 }
 0x2ba   : > { %3371 = vst [vmem:[%s5327_s29 + $0x10] sm:$0xff] %v3363_v14  ;;  %v3357_v24 = vadd.f32 %v3349_v10, %v3210_v15  ;;  %v3213_v25 = vadd.f32 %v5297_v49, %v3198_v17  ;;  %v3197_v38 = vmul.f32 %v5285_v8, %v3182_v18 }
 0x2bb   : > { %v3366_v28 = vmax.f32 %v3358_v19, 0.0 }
 0x2bc   : > { %v3365_v4 = vmax.f32 %v3357_v24, 0.0  ;;  %v3360_v32 = vadd.f32 %v3352_v12, %v3213_v25  ;;  %v3212_v22 = vadd.f32 %v5297_v49, %v3197_v38 }
 0x2bd   : > { %3374 = vst [vmem:[%s5327_s29 + $0x28] sm:$0xff] %v3366_v28 }
 0x2be   : > { %3373 = vst [vmem:[%s5327_s29 + $0x20] sm:$0xff] %v3365_v4  ;;  %v3368_v9 = vmax.f32 %v3360_v32, 0.0  ;;  %v3359_v26 = vadd.f32 %v3351_v23, %v3212_v22 }
 0x2c0   : > { %3376 = vst [vmem:[%s5327_s29 + $0x38] sm:$0xff] %v3368_v9  ;;  %v3367_v8 = vmax.f32 %v3359_v26, 0.0 }
 0x2c2   : > { %3375 = vst [vmem:[%s5327_s29 + $0x30] sm:$0xff] %v3367_v8 }
 0x2c3   : > { %4578 = shalt.err (!%p4575_p0)
}
 0x2c4   : > { %s4579_s27 = scalar_lea.hbm %s5355_s18, 1024  ;;  %s4583_s12 = scalar_lea.hbm %s5413_s10, 2048 }
 0x2c5   : > { %p4580_p1 = scmp.ne.s32.totalorder %s5355_s18, %s4579_s27  ;;  %p4584_p4 = scmp.lt.s32.totalorder %s5355_s18, %s5413_s10 }
 0x2c6   : > { %p4585_p7 = scmp.lt.s32.totalorder %s4583_s12, %s4579_s27 }
 0x2c7   : > { %p4581_p2 = pnand %p4580_p1, %p4731_p5 }
 0x2c8   : > { %p4586_p8 = por %p4585_p7, %p4584_p4 }
 0x2c9   : > { %p4582_p3 = pneg %p4581_p2 }
 0x2cb   : > { %p4587_p6 = pnand %p4586_p8, %p4582_p3 }
 0x2cd   : > { %4590 = shalt.err (!%p4587_p6)
}
 0x2ce   : > { %s4636_s20 = smov 128   ;;  %s4637_s25 = smov 8  }
 0x2cf   : > { %4479 = dma.vmem_to_hbm [thread:$0]  (%p4731_p5), %s5357_s11, 1024, %s5355_s18, %s5363_s17, %s4636_s20, %s4636_s20, %s4637_s25  }
 0x2d0 PF: > { %p4491_p9 = scmp.ge.s32.totalorder %s4629_s16, 2  ;;  %s3406_s28 = sand.u32 1, %s4617_s13  }
 0x2d1   : > { %p5451_p10 = scmp.ne.s32.totalorder %s5417_s24, 0  ;;  %s3407_s27 = scalar_lea.sflag [#allocation6], %s3406_s28 }
 0x2d3   : > { %p4486_p11 = pnand %p4491_p9, %p5451_p10 }
 0x2d5   : > { %p4487_p12 = pneg %p4486_p11 }
 0x2d7   : > { %4612 = dma.done.wait (%p4487_p12), %s3407_s27, 1024  }
 0x2d8   : > { %4614 = vsyncadd (%p4487_p12), %s3407_s27, 4294966272  ;;  %p21_p13 = scmp.ge.s32.totalorder %s4718_s19, 4   ;;  %s5452_s13 = smov %s4621_s14 }
 0x2d9   : > { %s5453_s14 = smov %s4625_s15  ;;  %s5454_s15 = smov %s4729_s22 }
 0x2da   : > { %s5455_s16 = smov %s4718_s19  ;;  %23 = sbr.rel (!%p21_p13) target bundleno = 4 (0x4), region = 194 }
 0x2df   :  { %3412 = vsyncpa [#allocation5], 1 }
 0x2e0   :  { %3414 = vsyncpa [#allocation5 + $0x1], 1 }
 0x2e1   :  { %3415 = vsyncpa [#allocation6], 1 }
 0x2e2   :  { %3417 = vsyncpa [#allocation6 + $0x1], 1 }

</bundles_post_ra>
